<compile_context>
chip_gen: v6e
topology: v6e:2x2x1
jax: 0.10.0
libtpu: 0.0.40
codegen_flags: <defaults>
</compile_context>

<pallas_src>
import jax
import jax.numpy as jnp
from jax.experimental import pallas as pl
from jax.experimental.pallas import tpu as pltpu

# (in_features, out_features) for each Linear in the trunk `self.fc`
TRUNK_DIMS = [(12, 1024), (1024, 512), (512, 256), (256, 128),
              (128, 64), (64, 32), (32, 16), (16, 12)]
ACTION_DIMS = (12, 2)
STATE_DIMS = (12, 1)

N_BIG = 4                                   # first 4 trunk layers kept as bf16 arrays
TAIL_DIMS = TRUNK_DIMS[N_BIG:]              # (128,64) (64,32) (32,16) (16,12)
HEAD_DIMS = (12, 2)                         # fused dueling head

# Output width of every matmul the kernel performs (trunk + fused head).
OUT_W = [d[1] for d in TRUNK_DIMS] + [HEAD_DIMS[1]]          # [1024,512,...,12,2]
# Bias segments padded to 128 lanes so in-kernel slices start lane-aligned.
_BIAS_PAD = [max(128, ((w + 127) // 128) * 128) for w in OUT_W]
BIAS_OFF = [sum(_BIAS_PAD[:i]) for i in range(len(_BIAS_PAD))]
BIAS_TOTAL = sum(_BIAS_PAD)                                  # 2560

# Tail weights (+ fused head weight) packed along rows; offsets are multiples of 8.
_TAIL_PACK_DIMS = TAIL_DIMS + [HEAD_DIMS]
TAIL_ROW_OFF = []
_r = 0
for (fi, _fo) in _TAIL_PACK_DIMS:
    TAIL_ROW_OFF.append(_r)
    _r += ((fi + 7) // 8) * 8
TAIL_ROWS = _r                                               # 256
TAIL_COLS = 64


def _model_kernel(x_ref, w0_ref, w1_ref, w2_ref, w3_ref, tail_ref, bias_ref, out_ref):
    def bias(i):
        return bias_ref[:, pl.ds(BIAS_OFF[i], OUT_W[i])]     # (1, OUT_W[i])

    h = x_ref[...]                                           # (B, 12) f32

    # Big trunk layers 0..3: bf16 weights, f32 accumulation.
    for i, w_ref in enumerate((w0_ref, w1_ref, w2_ref, w3_ref)):
        h = jnp.dot(h, w_ref[...], preferred_element_type=jnp.float32) + bias(i)
        h = jnp.maximum(h, 0.0)

    # Small trunk layers 4..7: f32 weights packed in tail_ref.
    for k, (fin, fout) in enumerate(TAIL_DIMS):
        w = tail_ref[pl.ds(TAIL_ROW_OFF[k], fin), pl.ds(0, fout)]
        h = jnp.dot(h, w, preferred_element_type=jnp.float32) + bias(N_BIG + k)
        h = jnp.maximum(h, 0.0)

    # Fused dueling head: out = h @ W_out + b_out  (== vs + va - mean(va)).
    k = len(TAIL_DIMS)
    w_out = tail_ref[pl.ds(TAIL_ROW_OFF[k], HEAD_DIMS[0]), pl.ds(0, HEAD_DIMS[1])]
    out_ref[...] = jnp.dot(h, w_out, preferred_element_type=jnp.float32) + bias(N_BIG + k)


def init_params(key):
    """Deterministic PyTorch-Linear-style init: U(-1/sqrt(fan_in), 1/sqrt(fan_in))."""
    params = []
    dims = TRUNK_DIMS + [STATE_DIMS, ACTION_DIMS]
    for (fan_in, fan_out) in dims:
        key, kw, kb = jax.random.split(key, 3)
        bound = 1.0 / jnp.sqrt(jnp.float32(fan_in))
        w = jax.random.uniform(kw, (fan_in, fan_out), jnp.float32, -bound, bound)  # (in, out)
        b = jax.random.uniform(kb, (1, fan_out), jnp.float32, -bound, bound)
        params.append((w, b))
    trunk = params[:len(TRUNK_DIMS)]
    w_state, b_state = params[len(TRUNK_DIMS)]
    w_action, b_action = params[len(TRUNK_DIMS) + 1]
    return trunk, (w_state, b_state), (w_action, b_action)


def pack_params(trunk, state_head, action_head):
    """One-time wrapper-side packing: head fusion, bf16 cast, DMA-count reduction."""
    w_s, b_s = state_head          # (12,1), (1,1)
    w_a, b_a = action_head         # (12,2), (1,2)

    # Fold the dueling head (exact — the tail of the net is linear).
    w_mean = 0.5 * (w_a[:, 0:1] + w_a[:, 1:2])               # (12,1)
    b_mean = 0.5 * (b_a[:, 0:1] + b_a[:, 1:2])               # (1,1)
    w_head = w_s + w_a - w_mean                              # (12,2)
    b_head = b_s + b_a - b_mean                              # (1,2)

    # Big trunk weights -> bf16 (HBM-bandwidth bound; halves the bytes).
    big = tuple(w.astype(jnp.bfloat16) for (w, _) in trunk[:N_BIG])

    # Pack small tail weights + fused head weight into one f32 buffer.
    tail_ws = [w for (w, _) in trunk[N_BIG:]] + [w_head]
    tail = jnp.zeros((TAIL_ROWS, TAIL_COLS), jnp.float32)
    for off, w in zip(TAIL_ROW_OFF, tail_ws):
        fi, fo = w.shape
        tail = tail.at[off:off + fi, 0:fo].set(w)

    # Pack all biases into one (1, BIAS_TOTAL) buffer at lane-aligned offsets.
    biases = [b for (_, b) in trunk] + [b_head]
    bias_buf = jnp.zeros((1, BIAS_TOTAL), jnp.float32)
    for off, b in zip(BIAS_OFF, biases):
        bias_buf = bias_buf.at[0:1, off:off + b.shape[1]].set(b)

    return big, tail, bias_buf


@jax.jit
def model_forward(state, w0, w1, w2, w3, tail, bias_buf):
    B = state.shape[0]
    vmem = pl.BlockSpec(memory_space=pltpu.MemorySpace.VMEM)

    all_mm_dims = TRUNK_DIMS + [HEAD_DIMS]
    flops = 2 * B * sum(fi * fo for fi, fo in all_mm_dims)
    bytes_accessed = (
        2 * (w0.size + w1.size + w2.size + w3.size)        # bf16 weights
        + 4 * (tail.size + bias_buf.size + state.size)     # f32 packed params + input
        + 4 * B * 2                                        # f32 output
    )

    return pl.pallas_call(
        _model_kernel,
        out_shape=jax.ShapeDtypeStruct((B, 2), jnp.float32),
        in_specs=[vmem] * 7,
        out_specs=vmem,
        compiler_params=pltpu.CompilerParams(vmem_limit_bytes=16 << 20),
        cost_estimate=pl.CostEstimate(
            flops=flops, transcendentals=0, bytes_accessed=bytes_accessed),
    )(state, w0, w1, w2, w3, tail, bias_buf)


def reference_forward(state, trunk, state_head, action_head):
    """Pure-JAX reference using the same effective weights the kernel sees
    (big trunk weights round-tripped through bf16)."""
    h = state
    for i, (w, b) in enumerate(trunk):
        w_eff = w.astype(jnp.bfloat16).astype(jnp.float32) if i < N_BIG else w
        h = jnp.maximum(h @ w_eff + b, 0.0)
    vs = h @ state_head[0] + state_head[1]
    va = h @ action_head[0] + action_head[1]
    return vs + va - jnp.mean(va, axis=-1, keepdims=True)


if __name__ == "__main__":
    key = jax.random.PRNGKey(0)
    key, k_in = jax.random.split(key)

    trunk, state_head, action_head = init_params(key)
    (w0, w1, w2, w3), tail, bias_buf = pack_params(trunk, state_head, action_head)

    B = 8  # small batch; at larger B add a parallel batch grid axis (v7x megacore)
    state = jax.random.normal(k_in, (B, 12), jnp.float32)

    out = model_forward(state, w0, w1, w2, w3, tail, bias_buf)
    jax.block_until_ready(out)

    ref = reference_forward(state, trunk, state_head, action_head)
    assert out.shape == (B, 2), out.shape
    assert jnp.allclose(out, ref, atol=1e-3, rtol=1e-3), (out, ref)

    print("KERNEL_OK")
</pallas_src>

<mosaic_0001>
module attributes {stable_mosaic.version = 11 : i64} {
  func.func @_model_kernel(%arg0: memref<8x12xf32, #tpu.memory_space<vmem>>, %arg1: memref<12x1024xbf16, #tpu.memory_space<vmem>>, %arg2: memref<1024x512xbf16, #tpu.memory_space<vmem>>, %arg3: memref<512x256xbf16, #tpu.memory_space<vmem>>, %arg4: memref<256x128xbf16, #tpu.memory_space<vmem>>, %arg5: memref<256x64xf32, #tpu.memory_space<vmem>>, %arg6: memref<1x2560xf32, #tpu.memory_space<vmem>>, %arg7: memref<8x2xf32, #tpu.memory_space<vmem>>) attributes {dimension_semantics = [], scalar_prefetch = 0 : i64, scratch_operands = 0 : i64, tpu.core_type = #tpu.core_type<tc>} {
    %c0 = arith.constant 0 : index
    %c0_0 = arith.constant 0 : index
    %0 = vector.load %arg0[%c0, %c0_0] : memref<8x12xf32, #tpu.memory_space<vmem>>, vector<8x12xf32>
    %c0_1 = arith.constant 0 : index
    %c0_2 = arith.constant 0 : index
    %1 = vector.load %arg1[%c0_1, %c0_2] : memref<12x1024xbf16, #tpu.memory_space<vmem>>, vector<12x1024xbf16>
    %cst = arith.constant dense<0.000000e+00> : vector<8x1024xf32>
    %2 = tpu.matmul %0, %1, %cst {dimension_numbers = #tpu.dot_dimension_numbers<[1], [0], [0], [1], [0, 0, 1, 1], [], []>} : vector<8x12xf32>, vector<12x1024xbf16>, vector<8x1024xf32> -> vector<8x1024xf32>
    %c0_3 = arith.constant 0 : index
    %c0_4 = arith.constant 0 : index
    %3 = vector.load %arg6[%c0_3, %c0_4] : memref<1x2560xf32, #tpu.memory_space<vmem>>, vector<1x1024xf32>
    %4 = vector.broadcast %3 : vector<1x1024xf32> to vector<8x1024xf32>
    %5 = arith.addf %2, %4 : vector<8x1024xf32>
    %cst_5 = arith.constant 0.000000e+00 : f32
    %6 = vector.broadcast %cst_5 : f32 to vector<8x1024xf32>
    %7 = arith.maximumf %5, %6 : vector<8x1024xf32>
    %c0_6 = arith.constant 0 : index
    %c0_7 = arith.constant 0 : index
    %8 = vector.load %arg2[%c0_6, %c0_7] : memref<1024x512xbf16, #tpu.memory_space<vmem>>, vector<1024x512xbf16>
    %cst_8 = arith.constant dense<0.000000e+00> : vector<8x512xf32>
    %9 = tpu.matmul %7, %8, %cst_8 {dimension_numbers = #tpu.dot_dimension_numbers<[1], [0], [0], [1], [0, 0, 1, 1], [], []>} : vector<8x1024xf32>, vector<1024x512xbf16>, vector<8x512xf32> -> vector<8x512xf32>
    %c0_9 = arith.constant 0 : index
    %c1024 = arith.constant 1024 : index
    %10 = vector.load %arg6[%c0_9, %c1024] : memref<1x2560xf32, #tpu.memory_space<vmem>>, vector<1x512xf32>
    %11 = vector.broadcast %10 : vector<1x512xf32> to vector<8x512xf32>
    %12 = arith.addf %9, %11 : vector<8x512xf32>
    %cst_10 = arith.constant 0.000000e+00 : f32
    %13 = vector.broadcast %cst_10 : f32 to vector<8x512xf32>
    %14 = arith.maximumf %12, %13 : vector<8x512xf32>
    %c0_11 = arith.constant 0 : index
    %c0_12 = arith.constant 0 : index
    %15 = vector.load %arg3[%c0_11, %c0_12] : memref<512x256xbf16, #tpu.memory_space<vmem>>, vector<512x256xbf16>
    %cst_13 = arith.constant dense<0.000000e+00> : vector<8x256xf32>
    %16 = tpu.matmul %14, %15, %cst_13 {dimension_numbers = #tpu.dot_dimension_numbers<[1], [0], [0], [1], [0, 0, 1, 1], [], []>} : vector<8x512xf32>, vector<512x256xbf16>, vector<8x256xf32> -> vector<8x256xf32>
    %c0_14 = arith.constant 0 : index
    %c1536 = arith.constant 1536 : index
    %17 = vector.load %arg6[%c0_14, %c1536] : memref<1x2560xf32, #tpu.memory_space<vmem>>, vector<1x256xf32>
    %18 = vector.broadcast %17 : vector<1x256xf32> to vector<8x256xf32>
    %19 = arith.addf %16, %18 : vector<8x256xf32>
    %cst_15 = arith.constant 0.000000e+00 : f32
    %20 = vector.broadcast %cst_15 : f32 to vector<8x256xf32>
    %21 = arith.maximumf %19, %20 : vector<8x256xf32>
    %c0_16 = arith.constant 0 : index
    %c0_17 = arith.constant 0 : index
    %22 = vector.load %arg4[%c0_16, %c0_17] : memref<256x128xbf16, #tpu.memory_space<vmem>>, vector<256x128xbf16>
    %cst_18 = arith.constant dense<0.000000e+00> : vector<8x128xf32>
    %23 = tpu.matmul %21, %22, %cst_18 {dimension_numbers = #tpu.dot_dimension_numbers<[1], [0], [0], [1], [0, 0, 1, 1], [], []>} : vector<8x256xf32>, vector<256x128xbf16>, vector<8x128xf32> -> vector<8x128xf32>
    %c0_19 = arith.constant 0 : index
    %c1792 = arith.constant 1792 : index
    %24 = vector.load %arg6[%c0_19, %c1792] : memref<1x2560xf32, #tpu.memory_space<vmem>>, vector<1x128xf32>
    %25 = vector.broadcast %24 : vector<1x128xf32> to vector<8x128xf32>
    %26 = arith.addf %23, %25 : vector<8x128xf32>
    %cst_20 = arith.constant 0.000000e+00 : f32
    %27 = vector.broadcast %cst_20 : f32 to vector<8x128xf32>
    %28 = arith.maximumf %26, %27 : vector<8x128xf32>
    %c0_21 = arith.constant 0 : index
    %c0_22 = arith.constant 0 : index
    %29 = vector.load %arg5[%c0_21, %c0_22] : memref<256x64xf32, #tpu.memory_space<vmem>>, vector<128x64xf32>
    %cst_23 = arith.constant dense<0.000000e+00> : vector<8x64xf32>
    %30 = tpu.matmul %28, %29, %cst_23 {dimension_numbers = #tpu.dot_dimension_numbers<[1], [0], [0], [1], [0, 0, 1, 1], [], []>} : vector<8x128xf32>, vector<128x64xf32>, vector<8x64xf32> -> vector<8x64xf32>
    %c0_24 = arith.constant 0 : index
    %c1920 = arith.constant 1920 : index
    %31 = vector.load %arg6[%c0_24, %c1920] : memref<1x2560xf32, #tpu.memory_space<vmem>>, vector<1x64xf32>
    %32 = vector.broadcast %31 : vector<1x64xf32> to vector<8x64xf32>
    %33 = arith.addf %30, %32 : vector<8x64xf32>
    %cst_25 = arith.constant 0.000000e+00 : f32
    %34 = vector.broadcast %cst_25 : f32 to vector<8x64xf32>
    %35 = arith.maximumf %33, %34 : vector<8x64xf32>
    %c128 = arith.constant 128 : index
    %c0_26 = arith.constant 0 : index
    %36 = vector.load %arg5[%c128, %c0_26] : memref<256x64xf32, #tpu.memory_space<vmem>>, vector<64x32xf32>
    %cst_27 = arith.constant dense<0.000000e+00> : vector<8x32xf32>
    %37 = tpu.matmul %35, %36, %cst_27 {dimension_numbers = #tpu.dot_dimension_numbers<[1], [0], [0], [1], [0, 0, 1, 1], [], []>} : vector<8x64xf32>, vector<64x32xf32>, vector<8x32xf32> -> vector<8x32xf32>
    %c0_28 = arith.constant 0 : index
    %c2048 = arith.constant 2048 : index
    %38 = vector.load %arg6[%c0_28, %c2048] : memref<1x2560xf32, #tpu.memory_space<vmem>>, vector<1x32xf32>
    %39 = vector.broadcast %38 : vector<1x32xf32> to vector<8x32xf32>
    %40 = arith.addf %37, %39 : vector<8x32xf32>
    %cst_29 = arith.constant 0.000000e+00 : f32
    %41 = vector.broadcast %cst_29 : f32 to vector<8x32xf32>
    %42 = arith.maximumf %40, %41 : vector<8x32xf32>
    %c192 = arith.constant 192 : index
    %c0_30 = arith.constant 0 : index
    %43 = vector.load %arg5[%c192, %c0_30] : memref<256x64xf32, #tpu.memory_space<vmem>>, vector<32x16xf32>
    %cst_31 = arith.constant dense<0.000000e+00> : vector<8x16xf32>
    %44 = tpu.matmul %42, %43, %cst_31 {dimension_numbers = #tpu.dot_dimension_numbers<[1], [0], [0], [1], [0, 0, 1, 1], [], []>} : vector<8x32xf32>, vector<32x16xf32>, vector<8x16xf32> -> vector<8x16xf32>
    %c0_32 = arith.constant 0 : index
    %c2176 = arith.constant 2176 : index
    %45 = vector.load %arg6[%c0_32, %c2176] : memref<1x2560xf32, #tpu.memory_space<vmem>>, vector<1x16xf32>
    %46 = vector.broadcast %45 : vector<1x16xf32> to vector<8x16xf32>
    %47 = arith.addf %44, %46 : vector<8x16xf32>
    %cst_33 = arith.constant 0.000000e+00 : f32
    %48 = vector.broadcast %cst_33 : f32 to vector<8x16xf32>
    %49 = arith.maximumf %47, %48 : vector<8x16xf32>
    %c224 = arith.constant 224 : index
    %c0_34 = arith.constant 0 : index
    %50 = vector.load %arg5[%c224, %c0_34] : memref<256x64xf32, #tpu.memory_space<vmem>>, vector<16x12xf32>
    %cst_35 = arith.constant dense<0.000000e+00> : vector<8x12xf32>
    %51 = tpu.matmul %49, %50, %cst_35 {dimension_numbers = #tpu.dot_dimension_numbers<[1], [0], [0], [1], [0, 0, 1, 1], [], []>} : vector<8x16xf32>, vector<16x12xf32>, vector<8x12xf32> -> vector<8x12xf32>
    %c0_36 = arith.constant 0 : index
    %c2304 = arith.constant 2304 : index
    %52 = vector.load %arg6[%c0_36, %c2304] : memref<1x2560xf32, #tpu.memory_space<vmem>>, vector<1x12xf32>
    %53 = vector.broadcast %52 : vector<1x12xf32> to vector<8x12xf32>
    %54 = arith.addf %51, %53 : vector<8x12xf32>
    %cst_37 = arith.constant 0.000000e+00 : f32
    %55 = vector.broadcast %cst_37 : f32 to vector<8x12xf32>
    %56 = arith.maximumf %54, %55 : vector<8x12xf32>
    %c240 = arith.constant 240 : index
    %c0_38 = arith.constant 0 : index
    %57 = vector.load %arg5[%c240, %c0_38] : memref<256x64xf32, #tpu.memory_space<vmem>>, vector<12x2xf32>
    %cst_39 = arith.constant dense<0.000000e+00> : vector<8x2xf32>
    %58 = tpu.matmul %56, %57, %cst_39 {dimension_numbers = #tpu.dot_dimension_numbers<[1], [0], [0], [1], [0, 0, 1, 1], [], []>} : vector<8x12xf32>, vector<12x2xf32>, vector<8x2xf32> -> vector<8x2xf32>
    %c0_40 = arith.constant 0 : index
    %c2432 = arith.constant 2432 : index
    %59 = vector.load %arg6[%c0_40, %c2432] : memref<1x2560xf32, #tpu.memory_space<vmem>>, vector<1x2xf32>
    %60 = vector.broadcast %59 : vector<1x2xf32> to vector<8x2xf32>
    %61 = arith.addf %58, %60 : vector<8x2xf32>
    %c0_41 = arith.constant 0 : index
    %c0_42 = arith.constant 0 : index
    %62 = vector.load %arg7[%c0_41, %c0_42] : memref<8x2xf32, #tpu.memory_space<vmem>>, vector<8x2xf32>
    tpu.vector_store %arg7[%c0_41, %c0_42], %61 {strides = array<i32>} : memref<8x2xf32, #tpu.memory_space<vmem>>, vector<8x2xf32>,
    return
  }
}

</mosaic_0001>

<bundles_post_ra>
// kernel: model_forward.1
= control target key start
LH: loop header
LB: loop body
LE: loop exit
PB: predicated region body
PF: predicated region fallthrough
CT: control target
= control target key end

     0   :  { %12 = vsyncpa [#allocation3], 0  ;;  %s4769_s0 = inlined_call_operand.vmem [shape: f32[8,12], index: 0, kind: input, shape index: {}]   ;;  %s4770_s1 = inlined_call_operand.vmem [shape: bf16[12,1024], index: 1, kind: input, shape index: {}]   ;;  %s4771_s2 = inlined_call_operand.hbm [shape: bf16[1024,512], index: 2, kind: input, shape index: {}]   ;;  %s4772_s3 = inlined_call_operand.hbm [shape: bf16[512,256], index: 3, kind: input, shape index: {}]   ;;  %s4773_s4 = inlined_call_operand.vmem [shape: bf16[256,128], index: 4, kind: input, shape index: {}]   ;;  %s4774_s5 = inlined_call_operand.vmem [shape: f32[256,64], index: 5, kind: input, shape index: {}]   ;;  %s4775_s6 = inlined_call_operand.vmem [shape: f32[1,2560], index: 6, kind: input, shape index: {}]   ;;  %s4776_s7 = inlined_call_operand.vmem [shape: f32[8,2], index: 7, kind: output, shape index: {}]  }
   0x1   :  { %13 = vsyncpa [#allocation5], 0  ;;  %s4349_s24 = smov [#allocation2]  }
   0x2   :  { %s23_s25 = sshll.u32 %s4349_s24, 4  ;;  %s24_s25 = int_to_ptr.vmem [resolvable:$true] %s23_s25 }
   0x3   :  { %s4313_s26 = scalar_lea.vmem %s24_s25, 32768  ;;  %p4318_p1 = scmp.lt.s32.totalorder %s24_s25, %s24_s25 }
   0x4   :  { %p4314_p0 = scmp.ne.s32.totalorder %s24_s25, %s4313_s26  ;;  %p4319_p2 = scmp.lt.s32.totalorder %s4313_s26, %s4313_s26 }
   0x6   :  { %p4320_p3 = por %p4319_p2, %p4318_p1 }
   0x8   :  { %p4321_p4 = pnand %p4320_p3, %p4314_p0 }
   0xa   :  { %4324 = shalt.err (!%p4321_p4)
}
   0xb   :  { %s4350_s27 = smov 256   ;;  %s4351_s28 = smov 16  }
   0xc   :  { %29 = dma.hbm_to_vmem [thread:$0]  %s4771_s2, 32768, %s24_s25, [#allocation3], %s4350_s27, %s4350_s27, %s4351_s28  }
   0xd   :  { %s4352_s8 = smov [#allocation4]  }
   0xe   :  { %s35_s9 = sshll.u32 %s4352_s8, 4  ;;  %s36_s9 = int_to_ptr.vmem [resolvable:$true] %s35_s9 }
   0xf   :  { %s4333_s10 = scalar_lea.vmem %s36_s9, 8192  ;;  %p4338_p6 = scmp.lt.s32.totalorder %s36_s9, %s36_s9 }
  0x10   :  { %p4334_p5 = scmp.ne.s32.totalorder %s36_s9, %s4333_s10  ;;  %p4339_p7 = scmp.lt.s32.totalorder %s4333_s10, %s4333_s10 }
  0x12   :  { %p4340_p8 = por %p4339_p7, %p4338_p6 }
  0x14   :  { %p4341_p9 = pnand %p4340_p8, %p4334_p5 }
  0x16   :  { %4344 = shalt.err (!%p4341_p9)
}
  0x17   :  { %s4353_s11 = smov 128   ;;  %s4354_s12 = smov 8  }
  0x18   :  { %41 = dma.hbm_to_vmem [thread:$0]  %s4772_s3, 8192, %s36_s9, [#allocation5], %s4353_s11, %s4353_s11, %s4354_s12  }
  0x19   :  { %4345 = dma.done.wait [#allocation3], 32768  }
  0x1a   :  { %4346 = vsyncadd [#allocation3], 4294934528 }
  0x1b   :  { %4347 = dma.done.wait [#allocation5], 8192  }
  0x1c   :  { %4348 = vsyncadd [#allocation5], 4294959104  ;;  %v4355_v0 = vmov 0.0   ;;  %v56_v1 = vld [vmem:[%s4770_s1] sm:$0xff]  ;;  %vm142_vm0 = vcmask 1045504   ;;  %v57_v3 = vld [vmem:[%s4770_s1 + $0x8] sm:$0xff] }
  0x1d   :  { %199 = vmatprep.mubr.f32.mxu0 %v4355_v0  ;;  %238 = vmatprep.mubr.f32.mxu1 %v4355_v0  ;;  %v60_v2 = vld [vmem:[%s4770_s1 + $0x20] sm:$0x33]  ;;  %v61_v5 = vld [vmem:[%s4770_s1 + $0x28] sm:$0x33]  ;;  %v58_v7 = vld [vmem:[%s4770_s1 + $0x10] sm:$0xff]  ;;  %vm138_vm1 = vcmask 97280  }
  0x1e   :  { %v3304_v4 = vcombine.high %v56_v1, %v60_v2  ;;  %v3303_v6 = vcombine.low %v56_v1, %v60_v2  ;;  %v3306_v8 = vcombine.high %v57_v3, %v61_v5  ;;  %v3305_v9 = vcombine.low %v57_v3, %v61_v5  ;;  %v62_v10 = vld [vmem:[%s4770_s1 + $0x30] sm:$0x33]  ;;  %v59_v11 = vld [vmem:[%s4770_s1 + $0x18] sm:$0xff]  ;;  %v55_v18 = vld [vmem:[%s4769_s0] sm:$0xff] }
  0x1f   :  { %v63_v12 = vld [vmem:[%s4770_s1 + $0x38] sm:$0x33]  ;;  %v3308_v14 = vcombine.high %v58_v7, %v62_v10  ;;  %v3307_v15 = vcombine.low %v58_v7, %v62_v10  ;;  %v3811_v22 = vld [vmem:[#allocation2 + $0xe4] ss:$16 sps:$4 sm:$0xff]   ;;  %v3809_v24 = vld [vmem:[#allocation2 + $0xe0] ss:$16 sps:$4 sm:$0xff]  }
  0x20   :  { %3311 = vmatprep.subr.msk.bf16.mxu0 %vm142_vm0, %v3304_v4  ;;  %v144_v13 = vsel %vm142_vm0, %v3303_v6, 0  ;;  %v3310_v16 = vcombine.high %v59_v11, %v63_v12  ;;  %3313 = vmatprep.subr.msk.bf16.mxu1 %vm142_vm0, %v3306_v8  ;;  %v150_v17 = vsel %vm142_vm0, %v3305_v9, 0  ;;  %v3309_v19 = vcombine.low %v59_v11, %v63_v12  ;;  %v3814_v23 = vld [vmem:[#allocation2 + $0x2e4] ss:$16 sps:$4 sm:$0xff]   ;;  %v3812_v25 = vld [vmem:[#allocation2 + $0x2e0] ss:$16 sps:$4 sm:$0xff]  }
  0x21   :  { %182 = vmatpush1.bf16.msra.mxu0 %v144_v13  ;;  %221 = vmatpush1.bf16.msra.mxu1 %v150_v17  ;;  %v156_v20 = vsel %vm142_vm0, %v3307_v15, 0  ;;  %v3817_v26 = vld [vmem:[#allocation2 + $0xc4] ss:$16 sps:$4 sm:$0xff]   ;;  %v3815_v28 = vld [vmem:[#allocation2 + $0xc0] ss:$16 sps:$4 sm:$0xff]   ;;  %vm4356_vm2 = vmmov 0  }
  0x22   :  { %3315 = vmatprep.subr.msk.bf16.mxu0 %vm142_vm0, %v3308_v14  ;;  %3317 = vmatprep.subr.msk.bf16.mxu1 %vm142_vm0, %v3310_v16  ;;  %v162_v21 = vsel %vm142_vm0, %v3309_v19, 0  ;;  %v3820_v27 = vld [vmem:[#allocation2 + $0x2c4] ss:$16 sps:$4 sm:$0xff]   ;;  %v3818_v29 = vld [vmem:[#allocation2 + $0x2c0] ss:$16 sps:$4 sm:$0xff]   ;;  %vm2964_vm3 = vcmask 523264  }
  0x23   :  { %v3823_v30 = vld [vmem:[#allocation2 + $0xa4] ss:$16 sps:$4 sm:$0xff]   ;;  %v3821_v32 = vld [vmem:[#allocation2 + $0xa0] ss:$16 sps:$4 sm:$0xff]   ;;  %vm3050_vm4 = vcmask 261120   ;;  %vm3134_vm5 = vcmask 130048  }
  0x24   :  { %3312 = vmatmul.mubr.msk.f32.vlgmr.msra.gmra.mxu0 %vm138_vm1, %v55_v18  ;;  %3314 = vmatmul.mubr.msk.f32.vlgmr.msra.gmra.mxu1 %vm138_vm1, %v55_v18  ;;  %v3826_v31 = vld [vmem:[#allocation2 + $0x2a4] ss:$16 sps:$4 sm:$0xff]   ;;  %v3824_v33 = vld [vmem:[#allocation2 + $0x2a0] ss:$16 sps:$4 sm:$0xff]   ;;  %vm3221_vm6 = vcmask 1043456   ;;  %vm3295_vm7 = vcmask 15360  }
  0x25   :  { %260 = vmatpush1.bf16.msra.mxu0 %v156_v20  ;;  %299 = vmatpush1.bf16.msra.mxu1 %v162_v21  ;;  %v3829_v34 = vld [vmem:[#allocation2 + $0x84] ss:$16 sps:$4 sm:$0xff]   ;;  %v3827_v36 = vld [vmem:[#allocation2 + $0x80] ss:$16 sps:$4 sm:$0xff]  }
  0x26   :  { %277 = vmatprep.mubr.f32.mxu0 %v4355_v0  ;;  %316 = vmatprep.mubr.f32.mxu1 %v4355_v0  ;;  %v3832_v35 = vld [vmem:[#allocation2 + $0x284] ss:$16 sps:$4 sm:$0xff]   ;;  %v3830_v37 = vld [vmem:[#allocation2 + $0x280] ss:$16 sps:$4 sm:$0xff]  }
  0x27   :  { %1889 = vmatprep.subr.bf16.mxu0 %v3811_v22  ;;  %1928 = vmatprep.subr.bf16.mxu1 %v3814_v23  ;;  %v3835_v38 = vld [vmem:[#allocation2 + $0x64] ss:$16 sps:$4 sm:$0xff]   ;;  %v3833_v40 = vld [vmem:[#allocation2 + $0x60] ss:$16 sps:$4 sm:$0xff]  }
  0x28   :  { %3316 = vmatmul.mubr.msk.f32.vlgmr.msra.gmra.mxu0 %vm138_vm1, %v55_v18  ;;  %3318 = vmatmul.mubr.msk.f32.vlgmr.msra.gmra.mxu1 %vm138_vm1, %v55_v18  ;;  %v3838_v39 = vld [vmem:[#allocation2 + $0x264] ss:$16 sps:$4 sm:$0xff]   ;;  %v3836_v41 = vld [vmem:[#allocation2 + $0x260] ss:$16 sps:$4 sm:$0xff]  }
  0x29   :  { %1890 = vmatpush1.bf16.msra.mxu0 %v3809_v24  ;;  %1929 = vmatpush1.bf16.msra.mxu1 %v3812_v25  ;;  %v3841_v42 = vld [vmem:[#allocation2 + $0x44] ss:$16 sps:$4 sm:$0xff]   ;;  %v3839_v44 = vld [vmem:[#allocation2 + $0x40] ss:$16 sps:$4 sm:$0xff]   ;;  %v66_v25 = vlaneseq }
  0x2a   :  { %1891 = vmatprep.subr.bf16.mxu0 %v3817_v26  ;;  %1930 = vmatprep.subr.bf16.mxu1 %v3820_v27  ;;  %v3844_v43 = vld [vmem:[#allocation2 + $0x244] ss:$16 sps:$4 sm:$0xff]   ;;  %v3842_v45 = vld [vmem:[#allocation2 + $0x240] ss:$16 sps:$4 sm:$0xff]  }
  0x2b   :  { %v3847_v46 = vld [vmem:[#allocation2 + $0x24] ss:$16 sps:$4 sm:$0xff]   ;;  %v3845_v48 = vld [vmem:[#allocation2 + $0x20] ss:$16 sps:$4 sm:$0xff]   ;;  %v4446_v26 = vshrl.u32 %v66_v25, 7 }
  0x2c   :  { %v3850_v47 = vld [vmem:[#allocation2 + $0x224] ss:$16 sps:$4 sm:$0xff]   ;;  %v3848_v49 = vld [vmem:[#allocation2 + $0x220] ss:$16 sps:$4 sm:$0xff]  }
  0x2d   :  { %1892 = vmatpush1.bf16.msra.mxu0 %v3815_v28  ;;  %1931 = vmatpush1.bf16.msra.mxu1 %v3818_v29  ;;  %v3853_v50 = vld [vmem:[#allocation2 + $0x4] ss:$16 sps:$4 sm:$0xff]   ;;  %v3851_v52 = vld [vmem:[#allocation2] ss:$16 sps:$4 sm:$0xff]   ;;  %v4449_v27 = vsub.s32 0, %v4446_v26  ;;  %v76_v28 = vsub.s32 2, %v4446_v26 }
  0x2e   :  { %1893 = vmatprep.subr.bf16.mxu0 %v3823_v30  ;;  %1932 = vmatprep.subr.bf16.mxu1 %v3826_v31  ;;  %v3856_v51 = vld [vmem:[#allocation2 + $0x204] ss:$16 sps:$4 sm:$0xff]   ;;  %v3854_v53 = vld [vmem:[#allocation2 + $0x200] ss:$16 sps:$4 sm:$0xff]   ;;  %v4458_v30 = vsub.s32 1, %v4446_v26  ;;  %v80_v31 = vsub.s32 3, %v4446_v26 }
  0x2f   :  { %v3859_v54 = vld [vmem:[#allocation2 + $0x1e4] ss:$16 sps:$4 sm:$0xff]   ;;  %v3857_v56 = vld [vmem:[#allocation2 + $0x1e0] ss:$16 sps:$4 sm:$0xff]  }
  0x30   :  { %v3862_v55 = vld [vmem:[#allocation2 + $0x3e4] ss:$16 sps:$4 sm:$0xff]   ;;  %v3860_v57 = vld [vmem:[#allocation2 + $0x3e0] ss:$16 sps:$4 sm:$0xff]  }
  0x31   :  { %1894 = vmatpush1.bf16.msra.mxu0 %v3821_v32  ;;  %1933 = vmatpush1.bf16.msra.mxu1 %v3824_v33  ;;  %v3865_v58 = vld [vmem:[#allocation2 + $0x1c4] ss:$16 sps:$4 sm:$0xff]   ;;  %v3863_v59 = vld [vmem:[#allocation2 + $0x1c0] ss:$16 sps:$4 sm:$0xff]  }
  0x32   :  { %1895 = vmatprep.subr.bf16.mxu0 %v3829_v34  ;;  %1934 = vmatprep.subr.bf16.mxu1 %v3832_v35  ;;  %v3868_v60 = vld [vmem:[#allocation2 + $0x3c4] ss:$16 sps:$4 sm:$0xff]   ;;  %v3866_v61 = vld [vmem:[#allocation2 + $0x3c0] ss:$16 sps:$4 sm:$0xff]   ;;  %v88_v35 = vsub.s32 5, %v4446_v26 }
  0x33   :  { %v3871_v62 = vld [vmem:[#allocation2 + $0x1a4] ss:$16 sps:$4 sm:$0xff]   ;;  %v3869_v1 = vld [vmem:[#allocation2 + $0x1a0] ss:$16 sps:$4 sm:$0xff]  }
  0x34   :  { %v3874_v63 = vld [vmem:[#allocation2 + $0x3a4] ss:$16 sps:$4 sm:$0xff]   ;;  %v3872_v2 = vld [vmem:[#allocation2 + $0x3a0] ss:$16 sps:$4 sm:$0xff]  }
  0x35   :  { %1896 = vmatpush1.bf16.msra.mxu0 %v3827_v36  ;;  %1935 = vmatpush1.bf16.msra.mxu1 %v3830_v37  ;;  %v3877_v3 = vld [vmem:[#allocation2 + $0x184] ss:$16 sps:$4 sm:$0xff]   ;;  %v3875_v5 = vld [vmem:[#allocation2 + $0x180] ss:$16 sps:$4 sm:$0xff]  }
  0x36   :  { %1897 = vmatprep.subr.bf16.mxu0 %v3835_v38  ;;  %1936 = vmatprep.subr.bf16.mxu1 %v3838_v39  ;;  %v3880_v4 = vld [vmem:[#allocation2 + $0x384] ss:$16 sps:$4 sm:$0xff]   ;;  %v3878_v6 = vld [vmem:[#allocation2 + $0x380] ss:$16 sps:$4 sm:$0xff]   ;;  %v96_v38 = vsub.s32 7, %v4446_v26 }
  0x37   :  { %v3883_v7 = vld [vmem:[#allocation2 + $0x164] ss:$16 sps:$4 sm:$0xff]   ;;  %v3881_v9 = vld [vmem:[#allocation2 + $0x160] ss:$16 sps:$4 sm:$0xff]  }
  0x38   :  { %v3886_v8 = vld [vmem:[#allocation2 + $0x364] ss:$16 sps:$4 sm:$0xff]   ;;  %v3884_v10 = vld [vmem:[#allocation2 + $0x360] ss:$16 sps:$4 sm:$0xff]  }
  0x39   :  { %1898 = vmatpush1.bf16.msra.mxu0 %v3833_v40  ;;  %1937 = vmatpush1.bf16.msra.mxu1 %v3836_v41  ;;  %v3889_v11 = vld [vmem:[#allocation2 + $0x144] ss:$16 sps:$4 sm:$0xff]   ;;  %v3887_v13 = vld [vmem:[#allocation2 + $0x140] ss:$16 sps:$4 sm:$0xff]  }
  0x3a   :  { %1899 = vmatprep.subr.bf16.mxu0 %v3841_v42  ;;  %1938 = vmatprep.subr.bf16.mxu1 %v3844_v43  ;;  %v3892_v12 = vld [vmem:[#allocation2 + $0x344] ss:$16 sps:$4 sm:$0xff]   ;;  %v3890_v14 = vld [vmem:[#allocation2 + $0x340] ss:$16 sps:$4 sm:$0xff]  }
  0x3b   :  { %v3895_v15 = vld [vmem:[#allocation2 + $0x124] ss:$16 sps:$4 sm:$0xff]   ;;  %v3893_v17 = vld [vmem:[#allocation2 + $0x120] ss:$16 sps:$4 sm:$0xff]  }
  0x3c   :  { %v3898_v16 = vld [vmem:[#allocation2 + $0x324] ss:$16 sps:$4 sm:$0xff]   ;;  %v3896_v18 = vld [vmem:[#allocation2 + $0x320] ss:$16 sps:$4 sm:$0xff]  }
  0x3d   :  { %1900 = vmatpush1.bf16.msra.mxu0 %v3839_v44  ;;  %1939 = vmatpush1.bf16.msra.mxu1 %v3842_v45  ;;  %v3901_v19 = vld [vmem:[#allocation2 + $0x104] ss:$16 sps:$4 sm:$0xff]   ;;  %v3899_v21 = vld [vmem:[#allocation2 + $0x100] ss:$16 sps:$4 sm:$0xff]  }
  0x3e   :  { %1901 = vmatprep.subr.bf16.mxu0 %v3847_v46  ;;  %1940 = vmatprep.subr.bf16.mxu1 %v3850_v47  ;;  %v3904_v20 = vld [vmem:[#allocation2 + $0x304] ss:$16 sps:$4 sm:$0xff]   ;;  %v3902_v22 = vld [vmem:[#allocation2 + $0x300] ss:$16 sps:$4 sm:$0xff]  }
  0x3f   :  { %v3907_v23 = vld [vmem:[#allocation2 + $0x4e4] ss:$16 sps:$4 sm:$0xff]   ;;  %v3947_v25 = vld [vmem:[#allocation2 + $0x400] ss:$16 sps:$4 sm:$0xff]  }
  0x40   :  { %v3910_v24 = vld [vmem:[#allocation2 + $0x6e4] ss:$16 sps:$4 sm:$0xff]  }
  0x41   :  { %1902 = vmatpush1.bf16.msra.mxu0 %v3845_v48  ;;  %1941 = vmatpush1.bf16.msra.mxu1 %v3848_v49  ;;  %v4455_v29 = vld [vmem:[%s4775_s6] sm:$0xff] }
  0x42   :  { %1903 = vmatprep.subr.bf16.mxu0 %v3853_v50  ;;  %1942 = vmatprep.subr.bf16.mxu1 %v3856_v51  ;;  %v69_v32 = vrot.slane %v4455_v29, %v4449_v27  ;;  %v77_v33 = vrot.slane %v4455_v29, %v76_v28  ;;  %v73_v34 = vrot.slane %v4455_v29, %v4458_v30  ;;  %v3905_v51 = vld [vmem:[#allocation2 + $0x4e0] ss:$16 sps:$4 sm:$0xff]  }
  0x43   :  { %v81_v37 = vrot.slane %v4455_v29, %v80_v31  ;;  %v89_v45 = vrot.slane %v4455_v29, %v88_v35  ;;  %v97_v48 = vrot.slane %v4455_v29, %v96_v38  ;;  %v3953_v35 = vld [vmem:[#allocation2 + $0x5e0] ss:$16 sps:$4 sm:$0xff]   ;;  %v3964_v38 = vld [vmem:[#allocation2 + $0x7c4] ss:$16 sps:$4 sm:$0xff]  }
  0x45   :  { %1904 = vmatpush1.bf16.msra.mxu0 %v3851_v52  ;;  %1943 = vmatpush1.bf16.msra.mxu1 %v3854_v53 }
  0x46   :  { %1905 = vmatprep.subr.bf16.mxu0 %v3859_v54  ;;  %1944 = vmatprep.subr.bf16.mxu1 %v3862_v55  ;;  %v3908_v55 = vld [vmem:[#allocation2 + $0x6e0] ss:$16 sps:$4 sm:$0xff]  }
  0x49   :  { %1906 = vmatpush2.bf16.msra.mxu0 %v3857_v56  ;;  %1945 = vmatpush2.bf16.msra.mxu1 %v3860_v57  ;;  %v3913_v56 = vld [vmem:[#allocation2 + $0x4c4] ss:$16 sps:$4 sm:$0xff]  }
  0x4a   :  { %1907 = vmatprep.subr.bf16.mxu0 %v3865_v58  ;;  %1946 = vmatprep.subr.bf16.mxu1 %v3868_v60  ;;  %v3916_v58 = vld [vmem:[#allocation2 + $0x6c4] ss:$16 sps:$4 sm:$0xff]  }
  0x4d   :  { %1908 = vmatpush2.bf16.msra.mxu0 %v3863_v59  ;;  %1947 = vmatpush2.bf16.msra.mxu1 %v3866_v61 }
  0x4e   :  { %1909 = vmatprep.subr.bf16.mxu0 %v3871_v62  ;;  %1948 = vmatprep.subr.bf16.mxu1 %v3874_v63  ;;  %v3911_v62 = vld [vmem:[#allocation2 + $0x4c0] ss:$16 sps:$4 sm:$0xff]  }
  0x51   :  { %1910 = vmatpush2.bf16.msra.mxu0 %v3869_v1  ;;  %1949 = vmatpush2.bf16.msra.mxu1 %v3872_v2  ;;  %v3914_v1 = vld [vmem:[#allocation2 + $0x6c0] ss:$16 sps:$4 sm:$0xff]   ;;  %v3919_v2 = vld [vmem:[#allocation2 + $0x4a4] ss:$16 sps:$4 sm:$0xff]  }
  0x52   :  { %1911 = vmatprep.subr.bf16.mxu0 %v3877_v3  ;;  %1950 = vmatprep.subr.bf16.mxu1 %v3880_v4  ;;  %v3922_v4 = vld [vmem:[#allocation2 + $0x6a4] ss:$16 sps:$4 sm:$0xff]  }
  0x55   :  { %1912 = vmatpush2.bf16.msra.mxu0 %v3875_v5  ;;  %1951 = vmatpush2.bf16.msra.mxu1 %v3878_v6  ;;  %v3917_v5 = vld [vmem:[#allocation2 + $0x4a0] ss:$16 sps:$4 sm:$0xff]  }
  0x56   :  { %1913 = vmatprep.subr.bf16.mxu0 %v3883_v7  ;;  %1952 = vmatprep.subr.bf16.mxu1 %v3886_v8  ;;  %v3920_v6 = vld [vmem:[#allocation2 + $0x6a0] ss:$16 sps:$4 sm:$0xff]   ;;  %v3925_v7 = vld [vmem:[#allocation2 + $0x484] ss:$16 sps:$4 sm:$0xff]  }
  0x57   :  { %v3928_v8 = vld [vmem:[#allocation2 + $0x684] ss:$16 sps:$4 sm:$0xff]  }
  0x59   :  { %1914 = vmatpush2.bf16.msra.mxu0 %v3881_v9  ;;  %1953 = vmatpush2.bf16.msra.mxu1 %v3884_v10  ;;  %v3923_v9 = vld [vmem:[#allocation2 + $0x480] ss:$16 sps:$4 sm:$0xff]  }
  0x5a   :  { %1915 = vmatprep.subr.bf16.mxu0 %v3889_v11  ;;  %1954 = vmatprep.subr.bf16.mxu1 %v3892_v12  ;;  %v3926_v10 = vld [vmem:[#allocation2 + $0x680] ss:$16 sps:$4 sm:$0xff]   ;;  %v3931_v11 = vld [vmem:[#allocation2 + $0x464] ss:$16 sps:$4 sm:$0xff]  }
  0x5b   :  { %v3934_v12 = vld [vmem:[#allocation2 + $0x664] ss:$16 sps:$4 sm:$0xff]  }
  0x5d   :  { %1916 = vmatpush2.bf16.msra.mxu0 %v3887_v13  ;;  %1955 = vmatpush2.bf16.msra.mxu1 %v3890_v14  ;;  %v3929_v13 = vld [vmem:[#allocation2 + $0x460] ss:$16 sps:$4 sm:$0xff]  }
  0x5e   :  { %1917 = vmatprep.subr.bf16.mxu0 %v3895_v15  ;;  %1956 = vmatprep.subr.bf16.mxu1 %v3898_v16  ;;  %v3932_v14 = vld [vmem:[#allocation2 + $0x660] ss:$16 sps:$4 sm:$0xff]   ;;  %v3937_v15 = vld [vmem:[#allocation2 + $0x444] ss:$16 sps:$4 sm:$0xff]  }
  0x5f   :  { %v3940_v16 = vld [vmem:[#allocation2 + $0x644] ss:$16 sps:$4 sm:$0xff]  }
  0x61   :  { %1918 = vmatpush2.bf16.msra.mxu0 %v3893_v17  ;;  %1957 = vmatpush2.bf16.msra.mxu1 %v3896_v18  ;;  %v3935_v17 = vld [vmem:[#allocation2 + $0x440] ss:$16 sps:$4 sm:$0xff]  }
  0x62   :  { %1919 = vmatprep.subr.bf16.mxu0 %v3901_v19  ;;  %1958 = vmatprep.subr.bf16.mxu1 %v3904_v20  ;;  %v3938_v18 = vld [vmem:[#allocation2 + $0x640] ss:$16 sps:$4 sm:$0xff]   ;;  %v3943_v19 = vld [vmem:[#allocation2 + $0x424] ss:$16 sps:$4 sm:$0xff]  }
  0x63   :  { %v3946_v20 = vld [vmem:[#allocation2 + $0x624] ss:$16 sps:$4 sm:$0xff]  }
  0x65   :  { %1920 = vmatpush2.bf16.msra.mxu0 %v3899_v21  ;;  %1959 = vmatpush2.bf16.msra.mxu1 %v3902_v22  ;;  %v3941_v21 = vld [vmem:[#allocation2 + $0x420] ss:$16 sps:$4 sm:$0xff]  }
  0x66   :  { %1967 = vmatprep.subr.bf16.mxu0 %v3907_v23  ;;  %2006 = vmatprep.subr.bf16.mxu1 %v3910_v24  ;;  %v3944_v22 = vld [vmem:[#allocation2 + $0x620] ss:$16 sps:$4 sm:$0xff]   ;;  %v3949_v23 = vld [vmem:[#allocation2 + $0x404] ss:$16 sps:$4 sm:$0xff]  }
  0x67   :  { %v3952_v24 = vld [vmem:[#allocation2 + $0x604] ss:$16 sps:$4 sm:$0xff]  }
  0xe4   :  { %v201_v36 = vpop.f32.mrf.mxu0  ;;  %v240_v39 = vpop.f32.mrf.mxu1 }
  0xe5   :  { %v4473_v40 = vadd.f32 %v201_v36, %v69_v32  ;;  %v4475_v41 = vadd.f32 %v240_v39, %v77_v33  ;;  %v3950_v32 = vld [vmem:[#allocation2 + $0x600] ss:$16 sps:$4 sm:$0xff]   ;;  %v3955_v33 = vld [vmem:[#allocation2 + $0x5e4] ss:$16 sps:$4 sm:$0xff]  }
  0xe6   :  { %v203_v42 = vpop.f32.mrf.mxu0  ;;  %v242_v44 = vpop.f32.mrf.mxu1  ;;  %v3956_v36 = vld [vmem:[#allocation2 + $0x7e0] ss:$16 sps:$4 sm:$0xff]  }
  0xe7   :  { %v4477_v43 = vadd.f32 %v203_v42, %v73_v34  ;;  %v4480_v46 = vadd.f32 %v242_v44, %v81_v37  ;;  %v325_v49 = vmax.f32 %v4475_v41, 0.0  ;;  %v323_v53 = vmax.f32 %v4473_v40, 0.0  ;;  %v3958_v34 = vld [vmem:[#allocation2 + $0x7e4] ss:$16 sps:$4 sm:$0xff]   ;;  %v3959_v39 = vld [vmem:[#allocation2 + $0x5c0] ss:$16 sps:$4 sm:$0xff]  }
  0xe8   :  { %v4482_v47 = vpop.f32.mrf.mxu0  ;;  %v4487_v52 = vpop.f32.mrf.mxu1  ;;  %v3961_v37 = vld [vmem:[#allocation2 + $0x5c4] ss:$16 sps:$4 sm:$0xff]   ;;  %v3962_v42 = vld [vmem:[#allocation2 + $0x7c0] ss:$16 sps:$4 sm:$0xff]   ;;  %v4109_v40 = vld [vmem:[#allocation2 + $0x4a8] ss:$16 sps:$4 sm:$0xff]  }
  0xe9   :  { %v324_v50 = vmax.f32 %v4477_v43, 0.0  ;;  %v326_v54 = vmax.f32 %v4480_v46, 0.0  ;;  %v3967_v44 = vld [vmem:[#allocation2 + $0x5a4] ss:$16 sps:$4 sm:$0xff]   ;;  %v4019_v43 = vld [vmem:[#allocation2 + $0x88] ss:$16 sps:$4 sm:$0xff]  }
  0xea   :  { %v281_v57 = vpop.f32.mrf.mxu0  ;;  %v320_v60 = vpop.f32.mrf.mxu1  ;;  %v4030_v46 = vld [vmem:[#allocation2 + $0x26c] ss:$16 sps:$4 sm:$0xff]   ;;  %v4112_v41 = vld [vmem:[#allocation2 + $0x6a8] ss:$16 sps:$4 sm:$0xff]  }
  0xeb   :  { %1921 = vmatprep.mubr.f32.mxu0 %v324_v50  ;;  %v4493_v59 = vadd.f32 %v281_v57, %v89_v45  ;;  %1960 = vmatprep.mubr.f32.mxu1 %v326_v54  ;;  %v4499_v61 = vadd.f32 %v320_v60, %v97_v48  ;;  %v3970_v45 = vld [vmem:[#allocation2 + $0x7a4] ss:$16 sps:$4 sm:$0xff]   ;;  %v3965_v48 = vld [vmem:[#allocation2 + $0x5a0] ss:$16 sps:$4 sm:$0xff]  }
  0xec   :  { %1922 = vmatmul.mubr.f32.vlgmr.msra.gmra.mxu0 %v323_v53  ;;  %1961 = vmatmul.mubr.f32.vlgmr.msra.gmra.mxu1 %v325_v49  ;;  %v3971_v57 = vld [vmem:[#allocation2 + $0x580] ss:$16 sps:$4 sm:$0xff]   ;;  %v3979_v60 = vld [vmem:[#allocation2 + $0x564] ss:$16 sps:$4 sm:$0xff]  }
  0xed   :  { %1968 = vmatpush1.bf16.msra.mxu0 %v3905_v51  ;;  %v328_v63 = vmax.f32 %v4493_v59, 0.0  ;;  %2007 = vmatpush1.bf16.msra.mxu1 %v3908_v55  ;;  %v330_v3 = vmax.f32 %v4499_v61, 0.0  ;;  %v3968_v51 = vld [vmem:[#allocation2 + $0x7a0] ss:$16 sps:$4 sm:$0xff]   ;;  %v3973_v55 = vld [vmem:[#allocation2 + $0x584] ss:$16 sps:$4 sm:$0xff]  }
  0xee   :  { %1969 = vmatprep.subr.bf16.mxu0 %v3913_v56  ;;  %2008 = vmatprep.subr.bf16.mxu1 %v3916_v58  ;;  %v3976_v56 = vld [vmem:[#allocation2 + $0x784] ss:$16 sps:$4 sm:$0xff]   ;;  %v3974_v58 = vld [vmem:[#allocation2 + $0x780] ss:$16 sps:$4 sm:$0xff]   ;;  %v4115_v59 = vld [vmem:[#allocation2 + $0x488] ss:$16 sps:$4 sm:$0xff]  }
  0xef   :  { %1999 = vmatprep.mubr.f32.mxu0 %v328_v63  ;;  %2038 = vmatprep.mubr.f32.mxu1 %v330_v3  ;;  %v4126_v61 = vld [vmem:[#allocation2 + $0x66c] ss:$16 sps:$4 sm:$0xff]  }
  0xf1   :  { %1970 = vmatpush1.bf16.msra.mxu0 %v3911_v62  ;;  %2009 = vmatpush1.bf16.msra.mxu1 %v3914_v1  ;;  %v3982_v62 = vld [vmem:[#allocation2 + $0x764] ss:$16 sps:$4 sm:$0xff]   ;;  %v3977_v1 = vld [vmem:[#allocation2 + $0x560] ss:$16 sps:$4 sm:$0xff]  }
  0xf2   :  { %1971 = vmatprep.subr.bf16.mxu0 %v3919_v2  ;;  %2010 = vmatprep.subr.bf16.mxu1 %v3922_v4  ;;  %v3980_v2 = vld [vmem:[#allocation2 + $0x760] ss:$16 sps:$4 sm:$0xff]   ;;  %v3985_v4 = vld [vmem:[#allocation2 + $0x544] ss:$16 sps:$4 sm:$0xff]  }
  0xf5   :  { %1972 = vmatpush1.bf16.msra.mxu0 %v3917_v5  ;;  %2011 = vmatpush1.bf16.msra.mxu1 %v3920_v6  ;;  %v3988_v5 = vld [vmem:[#allocation2 + $0x744] ss:$16 sps:$4 sm:$0xff]   ;;  %v3983_v6 = vld [vmem:[#allocation2 + $0x540] ss:$16 sps:$4 sm:$0xff]  }
  0xf6   :  { %1973 = vmatprep.subr.bf16.mxu0 %v3925_v7  ;;  %2012 = vmatprep.subr.bf16.mxu1 %v3928_v8  ;;  %v92_v7 = vsub.s32 6, %v4446_v26  ;;  %v3986_v8 = vld [vmem:[#allocation2 + $0x740] ss:$16 sps:$4 sm:$0xff]  }
  0xf9   :  { %1974 = vmatpush1.bf16.msra.mxu0 %v3923_v9  ;;  %2013 = vmatpush1.bf16.msra.mxu1 %v3926_v10  ;;  %v84_v9 = vsub.s32 4, %v4446_v26  ;;  %v3991_v10 = vld [vmem:[#allocation2 + $0x524] ss:$16 sps:$4 sm:$0xff]   ;;  %v4301_v26 = vld [vmem:[%s4773_s4 + $0x48] sm:$0xff]  }
  0xfa   :  { %1975 = vmatprep.subr.bf16.mxu0 %v3931_v11  ;;  %2014 = vmatprep.subr.bf16.mxu1 %v3934_v12  ;;  %v3994_v11 = vld [vmem:[#allocation2 + $0x724] ss:$16 sps:$4 sm:$0xff]   ;;  %v93_v12 = vrot.slane %v4455_v29, %v92_v7  ;;  %v4054_v7 = vld [vmem:[#allocation2 + $0x3ec] ss:$16 sps:$4 sm:$0xff]  }
  0xfd   :  { %1976 = vmatpush1.bf16.msra.mxu0 %v3929_v13  ;;  %2015 = vmatpush1.bf16.msra.mxu1 %v3932_v14  ;;  %v3989_v13 = vld [vmem:[#allocation2 + $0x520] ss:$16 sps:$4 sm:$0xff]   ;;  %v85_v14 = vrot.slane %v4455_v29, %v84_v9  ;;  %v4052_v9 = vld [vmem:[#allocation2 + $0x3e8] ss:$16 sps:$4 sm:$0xff]  }
  0xfe   :  { %1977 = vmatprep.subr.bf16.mxu0 %v3937_v15  ;;  %2016 = vmatprep.subr.bf16.mxu1 %v3940_v16  ;;  %v3992_v15 = vld [vmem:[#allocation2 + $0x720] ss:$16 sps:$4 sm:$0xff]   ;;  %v3997_v16 = vld [vmem:[#allocation2 + $0x504] ss:$16 sps:$4 sm:$0xff]  }
 0x101   :  { %1978 = vmatpush1.bf16.msra.mxu0 %v3935_v17  ;;  %2017 = vmatpush1.bf16.msra.mxu1 %v3938_v18  ;;  %v4000_v17 = vld [vmem:[#allocation2 + $0x704] ss:$16 sps:$4 sm:$0xff]   ;;  %v4514_v18 = vadd.f32 %v4487_v52, %v93_v12  ;;  %v4004_v52 = vld [vmem:[#allocation2 + $0x2e8] ss:$16 sps:$4 sm:$0xff]  }
 0x102   :  { %1979 = vmatprep.subr.bf16.mxu0 %v3943_v19  ;;  %2018 = vmatprep.subr.bf16.mxu1 %v3946_v20  ;;  %v3995_v19 = vld [vmem:[#allocation2 + $0x500] ss:$16 sps:$4 sm:$0xff]   ;;  %v4517_v20 = vadd.f32 %v4482_v47, %v85_v14  ;;  %v4012_v47 = vld [vmem:[#allocation2 + $0x2cc] ss:$16 sps:$4 sm:$0xff]   ;;  %v4055_v12 = vld [vmem:[#allocation2 + $0x1c8] ss:$16 sps:$4 sm:$0xff]  }
 0x103   :  { %v329_v29 = vmax.f32 %v4514_v18, 0.0  ;;  %v4063_v14 = vld [vmem:[#allocation2 + $0x1ac] ss:$16 sps:$4 sm:$0xff]  }
 0x104   :  { %v4207_v18 = vld [vmem:[#allocation4 + $0x34] ss:$8 sps:$4 sm:$0xff]  }
 0x105   :  { %1980 = vmatpush1.bf16.msra.mxu0 %v3941_v21  ;;  %2019 = vmatpush1.bf16.msra.mxu1 %v3944_v22  ;;  %v3998_v21 = vld [vmem:[#allocation2 + $0x700] ss:$16 sps:$4 sm:$0xff]   ;;  %v4003_v22 = vld [vmem:[#allocation2 + $0xec] ss:$16 sps:$4 sm:$0xff]  }
 0x106   :  { %1981 = vmatprep.subr.bf16.mxu0 %v3949_v23  ;;  %2020 = vmatprep.subr.bf16.mxu1 %v3952_v24  ;;  %v4006_v23 = vld [vmem:[#allocation2 + $0x2ec] ss:$16 sps:$4 sm:$0xff]   ;;  %v4001_v24 = vld [vmem:[#allocation2 + $0xe8] ss:$16 sps:$4 sm:$0xff]  }
 0x109   :  { %1982 = vmatpush1.bf16.msra.mxu0 %v3947_v25  ;;  %2021 = vmatpush1.bf16.msra.mxu1 %v3950_v32  ;;  %v327_v25 = vmax.f32 %v4517_v20, 0.0  ;;  %v4009_v32 = vld [vmem:[#allocation2 + $0xcc] ss:$16 sps:$4 sm:$0xff]   ;;  %v4202_v20 = vld [vmem:[#allocation4 + $0x40] ss:$8 sps:$4 sm:$0xff]  }
 0x10a   :  { %1983 = vmatprep.subr.bf16.mxu0 %v3955_v33  ;;  %2022 = vmatprep.subr.bf16.mxu1 %v3958_v34  ;;  %v4007_v33 = vld [vmem:[#allocation2 + $0xc8] ss:$16 sps:$4 sm:$0xff]  }
 0x10b   :  { %v4010_v34 = vld [vmem:[#allocation2 + $0x2c8] ss:$16 sps:$4 sm:$0xff]  }
 0x10d   :  { %1984 = vmatpush2.bf16.msra.mxu0 %v3953_v35  ;;  %2023 = vmatpush2.bf16.msra.mxu1 %v3956_v36  ;;  %v4015_v35 = vld [vmem:[#allocation2 + $0xac] ss:$16 sps:$4 sm:$0xff]  }
 0x10e   :  { %1985 = vmatprep.subr.bf16.mxu0 %v3961_v37  ;;  %2024 = vmatprep.subr.bf16.mxu1 %v3964_v38  ;;  %v4018_v36 = vld [vmem:[#allocation2 + $0x2ac] ss:$16 sps:$4 sm:$0xff]   ;;  %v4013_v37 = vld [vmem:[#allocation2 + $0xa8] ss:$16 sps:$4 sm:$0xff]  }
 0x10f   :  { %v4016_v38 = vld [vmem:[#allocation2 + $0x2a8] ss:$16 sps:$4 sm:$0xff]  }
 0x111   :  { %1986 = vmatpush2.bf16.msra.mxu0 %v3959_v39  ;;  %2025 = vmatpush2.bf16.msra.mxu1 %v3962_v42  ;;  %v4021_v39 = vld [vmem:[#allocation2 + $0x8c] ss:$16 sps:$4 sm:$0xff]  }
 0x112   :  { %1987 = vmatprep.subr.bf16.mxu0 %v3967_v44  ;;  %2026 = vmatprep.subr.bf16.mxu1 %v3970_v45  ;;  %v4024_v42 = vld [vmem:[#allocation2 + $0x28c] ss:$16 sps:$4 sm:$0xff]   ;;  %v4028_v45 = vld [vmem:[#allocation2 + $0x268] ss:$16 sps:$4 sm:$0xff]  }
 0x113   :  { %v4027_v44 = vld [vmem:[#allocation2 + $0x6c] ss:$16 sps:$4 sm:$0xff]  }
 0x115   :  { %1988 = vmatpush2.bf16.msra.mxu0 %v3965_v48  ;;  %2027 = vmatpush2.bf16.msra.mxu1 %v3968_v51  ;;  %v4033_v48 = vld [vmem:[#allocation2 + $0x4c] ss:$16 sps:$4 sm:$0xff]  }
 0x116   :  { %1989 = vmatprep.subr.bf16.mxu0 %v3973_v55  ;;  %2028 = vmatprep.subr.bf16.mxu1 %v3976_v56  ;;  %v4036_v51 = vld [vmem:[#allocation2 + $0x24c] ss:$16 sps:$4 sm:$0xff]   ;;  %v4031_v55 = vld [vmem:[#allocation2 + $0x48] ss:$16 sps:$4 sm:$0xff]  }
 0x117   :  { %v4034_v56 = vld [vmem:[#allocation2 + $0x248] ss:$16 sps:$4 sm:$0xff]  }
 0x119   :  { %1990 = vmatpush2.bf16.msra.mxu0 %v3971_v57  ;;  %2029 = vmatpush2.bf16.msra.mxu1 %v3974_v58  ;;  %v4039_v57 = vld [vmem:[#allocation2 + $0x2c] ss:$16 sps:$4 sm:$0xff]  }
 0x11a   :  { %1991 = vmatprep.subr.bf16.mxu0 %v3979_v60  ;;  %2030 = vmatprep.subr.bf16.mxu1 %v3982_v62  ;;  %v4042_v58 = vld [vmem:[#allocation2 + $0x22c] ss:$16 sps:$4 sm:$0xff]   ;;  %v4037_v60 = vld [vmem:[#allocation2 + $0x28] ss:$16 sps:$4 sm:$0xff]  }
 0x11b   :  { %v4040_v62 = vld [vmem:[#allocation2 + $0x228] ss:$16 sps:$4 sm:$0xff]  }
 0x11d   :  { %1992 = vmatpush2.bf16.msra.mxu0 %v3977_v1  ;;  %2031 = vmatpush2.bf16.msra.mxu1 %v3980_v2  ;;  %v4045_v1 = vld [vmem:[#allocation2 + $0xc] ss:$16 sps:$4 sm:$0xff]  }
 0x11e   :  { %1993 = vmatprep.subr.bf16.mxu0 %v3985_v4  ;;  %2032 = vmatprep.subr.bf16.mxu1 %v3988_v5  ;;  %v4048_v2 = vld [vmem:[#allocation2 + $0x20c] ss:$16 sps:$4 sm:$0xff]   ;;  %v4043_v4 = vld [vmem:[#allocation2 + $0x8] ss:$16 sps:$4 sm:$0xff]  }
 0x11f   :  { %v4046_v5 = vld [vmem:[#allocation2 + $0x208] ss:$16 sps:$4 sm:$0xff]  }
 0x121   :  { %1994 = vmatpush2.bf16.msra.mxu0 %v3983_v6  ;;  %2033 = vmatpush2.bf16.msra.mxu1 %v3986_v8  ;;  %v4051_v6 = vld [vmem:[#allocation2 + $0x1ec] ss:$16 sps:$4 sm:$0xff]   ;;  %v4049_v8 = vld [vmem:[#allocation2 + $0x1e8] ss:$16 sps:$4 sm:$0xff]  }
 0x122   :  { %1995 = vmatprep.subr.bf16.mxu0 %v3991_v10  ;;  %2034 = vmatprep.subr.bf16.mxu1 %v3994_v11  ;;  %v4057_v10 = vld [vmem:[#allocation2 + $0x1cc] ss:$16 sps:$4 sm:$0xff]  }
 0x123   :  { %v4060_v11 = vld [vmem:[#allocation2 + $0x3cc] ss:$16 sps:$4 sm:$0xff]  }
 0x125   :  { %1996 = vmatpush2.bf16.msra.mxu0 %v3989_v13  ;;  %2035 = vmatpush2.bf16.msra.mxu1 %v3992_v15  ;;  %v4058_v13 = vld [vmem:[#allocation2 + $0x3c8] ss:$16 sps:$4 sm:$0xff]   ;;  %v4066_v15 = vld [vmem:[#allocation2 + $0x3ac] ss:$16 sps:$4 sm:$0xff]  }
 0x126   :  { %1997 = vmatprep.subr.bf16.mxu0 %v3997_v16  ;;  %2036 = vmatprep.subr.bf16.mxu1 %v4000_v17  ;;  %v4061_v16 = vld [vmem:[#allocation2 + $0x1a8] ss:$16 sps:$4 sm:$0xff]  }
 0x127   :  { %v4064_v17 = vld [vmem:[#allocation2 + $0x3a8] ss:$16 sps:$4 sm:$0xff]  }
 0x129   :  { %1998 = vmatpush2.bf16.msra.mxu0 %v3995_v19  ;;  %2037 = vmatpush2.bf16.msra.mxu1 %v3998_v21  ;;  %v4069_v19 = vld [vmem:[#allocation2 + $0x18c] ss:$16 sps:$4 sm:$0xff]  }
 0x12a   :  { %2045 = vmatprep.subr.bf16.mxu0 %v4003_v22  ;;  %2084 = vmatprep.subr.bf16.mxu1 %v4006_v23  ;;  %v4072_v21 = vld [vmem:[#allocation2 + $0x38c] ss:$16 sps:$4 sm:$0xff]   ;;  %v4067_v22 = vld [vmem:[#allocation2 + $0x188] ss:$16 sps:$4 sm:$0xff]  }
 0x12b   :  { %v4070_v23 = vld [vmem:[#allocation2 + $0x388] ss:$16 sps:$4 sm:$0xff]  }
 0x12c   :  { %2000 = vmatmul.mubr.f32.vlgmr.msra.gmra.mxu0 %v327_v25  ;;  %2039 = vmatmul.mubr.f32.vlgmr.msra.gmra.mxu1 %v329_v29 }
 0x12d   :  { %2046 = vmatpush1.bf16.msra.mxu0 %v4001_v24  ;;  %2077 = vmatprep.mubr.f32.mxu0 %v324_v50  ;;  %v4022_v50 = vld [vmem:[#allocation2 + $0x288] ss:$16 sps:$4 sm:$0xff]   ;;  %v4075_v24 = vld [vmem:[#allocation2 + $0x16c] ss:$16 sps:$4 sm:$0xff]  }
 0x12e   :  { %2085 = vmatpush1.bf16.msra.mxu1 %v4004_v52  ;;  %2116 = vmatprep.mubr.f32.mxu1 %v326_v54  ;;  %v4025_v54 = vld [vmem:[#allocation2 + $0x68] ss:$16 sps:$4 sm:$0xff]   ;;  %v4078_v52 = vld [vmem:[#allocation2 + $0x36c] ss:$16 sps:$4 sm:$0xff]  }
 0x12f   :  { %2047 = vmatprep.subr.bf16.mxu0 %v4009_v32  ;;  %2086 = vmatprep.subr.bf16.mxu1 %v4012_v47  ;;  %v4073_v32 = vld [vmem:[#allocation2 + $0x168] ss:$16 sps:$4 sm:$0xff]  }
 0x130   :  { %v4076_v47 = vld [vmem:[#allocation2 + $0x368] ss:$16 sps:$4 sm:$0xff]  }
 0x131   :  { %2048 = vmatpush1.bf16.msra.mxu0 %v4007_v33  ;;  %v4081_v33 = vld [vmem:[#allocation2 + $0x14c] ss:$16 sps:$4 sm:$0xff]  }
 0x132   :  { %2087 = vmatpush1.bf16.msra.mxu1 %v4010_v34  ;;  %2049 = vmatprep.subr.bf16.mxu0 %v4015_v35  ;;  %v4084_v34 = vld [vmem:[#allocation2 + $0x34c] ss:$16 sps:$4 sm:$0xff]   ;;  %v4079_v35 = vld [vmem:[#allocation2 + $0x148] ss:$16 sps:$4 sm:$0xff]  }
 0x133   :  { %2088 = vmatprep.subr.bf16.mxu1 %v4018_v36  ;;  %v4082_v36 = vld [vmem:[#allocation2 + $0x348] ss:$16 sps:$4 sm:$0xff]  }
 0x135   :  { %2050 = vmatpush1.bf16.msra.mxu0 %v4013_v37  ;;  %v4087_v37 = vld [vmem:[#allocation2 + $0x12c] ss:$16 sps:$4 sm:$0xff]  }
 0x136   :  { %2089 = vmatpush1.bf16.msra.mxu1 %v4016_v38  ;;  %2051 = vmatprep.subr.bf16.mxu0 %v4021_v39  ;;  %v4090_v38 = vld [vmem:[#allocation2 + $0x32c] ss:$16 sps:$4 sm:$0xff]   ;;  %v4085_v39 = vld [vmem:[#allocation2 + $0x128] ss:$16 sps:$4 sm:$0xff]  }
 0x137   :  { %2090 = vmatprep.subr.bf16.mxu1 %v4024_v42  ;;  %v4088_v42 = vld [vmem:[#allocation2 + $0x328] ss:$16 sps:$4 sm:$0xff]  }
 0x139   :  { %2052 = vmatpush1.bf16.msra.mxu0 %v4019_v43  ;;  %v4093_v43 = vld [vmem:[#allocation2 + $0x10c] ss:$16 sps:$4 sm:$0xff]  }
 0x13a   :  { %2091 = vmatpush1.bf16.msra.mxu1 %v4022_v50  ;;  %2053 = vmatprep.subr.bf16.mxu0 %v4027_v44  ;;  %v4096_v50 = vld [vmem:[#allocation2 + $0x30c] ss:$16 sps:$4 sm:$0xff]   ;;  %v4091_v44 = vld [vmem:[#allocation2 + $0x108] ss:$16 sps:$4 sm:$0xff]  }
 0x13b   :  { %2092 = vmatprep.subr.bf16.mxu1 %v4030_v46  ;;  %v4094_v46 = vld [vmem:[#allocation2 + $0x308] ss:$16 sps:$4 sm:$0xff]  }
 0x13d   :  { %2054 = vmatpush1.bf16.msra.mxu0 %v4025_v54  ;;  %v4099_v54 = vld [vmem:[#allocation2 + $0x4ec] ss:$16 sps:$4 sm:$0xff]  }
 0x13e   :  { %2093 = vmatpush1.bf16.msra.mxu1 %v4028_v45  ;;  %2055 = vmatprep.subr.bf16.mxu0 %v4033_v48  ;;  %v4102_v45 = vld [vmem:[#allocation2 + $0x6ec] ss:$16 sps:$4 sm:$0xff]   ;;  %v4097_v48 = vld [vmem:[#allocation2 + $0x4e8] ss:$16 sps:$4 sm:$0xff]  }
 0x13f   :  { %2094 = vmatprep.subr.bf16.mxu1 %v4036_v51  ;;  %v4100_v51 = vld [vmem:[#allocation2 + $0x6e8] ss:$16 sps:$4 sm:$0xff]  }
 0x141   :  { %2056 = vmatpush1.bf16.msra.mxu0 %v4031_v55  ;;  %v4105_v55 = vld [vmem:[#allocation2 + $0x4cc] ss:$16 sps:$4 sm:$0xff]  }
 0x142   :  { %2095 = vmatpush1.bf16.msra.mxu1 %v4034_v56  ;;  %2057 = vmatprep.subr.bf16.mxu0 %v4039_v57  ;;  %v4108_v56 = vld [vmem:[#allocation2 + $0x6cc] ss:$16 sps:$4 sm:$0xff]   ;;  %v4103_v57 = vld [vmem:[#allocation2 + $0x4c8] ss:$16 sps:$4 sm:$0xff]  }
 0x143   :  { %2096 = vmatprep.subr.bf16.mxu1 %v4042_v58  ;;  %v4106_v58 = vld [vmem:[#allocation2 + $0x6c8] ss:$16 sps:$4 sm:$0xff]  }
 0x145   :  { %2058 = vmatpush1.bf16.msra.mxu0 %v4037_v60  ;;  %v4111_v60 = vld [vmem:[#allocation2 + $0x4ac] ss:$16 sps:$4 sm:$0xff]  }
 0x146   :  { %2097 = vmatpush1.bf16.msra.mxu1 %v4040_v62  ;;  %2059 = vmatprep.subr.bf16.mxu0 %v4045_v1  ;;  %v4114_v62 = vld [vmem:[#allocation2 + $0x6ac] ss:$16 sps:$4 sm:$0xff]  }
 0x147   :  { %2098 = vmatprep.subr.bf16.mxu1 %v4048_v2  ;;  %v4123_v1 = vld [vmem:[#allocation2 + $0x46c] ss:$16 sps:$4 sm:$0xff]   ;;  %v4124_v2 = vld [vmem:[#allocation2 + $0x668] ss:$16 sps:$4 sm:$0xff]  }
 0x149   :  { %2060 = vmatpush1.bf16.msra.mxu0 %v4043_v4  ;;  %v4129_v4 = vld [vmem:[#allocation2 + $0x44c] ss:$16 sps:$4 sm:$0xff]  }
 0x14a   :  { %2099 = vmatpush1.bf16.msra.mxu1 %v4046_v5  ;;  %2061 = vmatprep.subr.bf16.mxu0 %v4051_v6  ;;  %v4132_v5 = vld [vmem:[#allocation2 + $0x64c] ss:$16 sps:$4 sm:$0xff]   ;;  %v4127_v6 = vld [vmem:[#allocation2 + $0x448] ss:$16 sps:$4 sm:$0xff]  }
 0x14b   :  { %2100 = vmatprep.subr.bf16.mxu1 %v4054_v7  ;;  %v4130_v7 = vld [vmem:[#allocation2 + $0x648] ss:$16 sps:$4 sm:$0xff]  }
 0x14d   :  { %2062 = vmatpush2.bf16.msra.mxu0 %v4049_v8  ;;  %v4135_v8 = vld [vmem:[#allocation2 + $0x42c] ss:$16 sps:$4 sm:$0xff]  }
 0x14e   :  { %2101 = vmatpush2.bf16.msra.mxu1 %v4052_v9  ;;  %2063 = vmatprep.subr.bf16.mxu0 %v4057_v10  ;;  %v4138_v9 = vld [vmem:[#allocation2 + $0x62c] ss:$16 sps:$4 sm:$0xff]   ;;  %v4133_v10 = vld [vmem:[#allocation2 + $0x428] ss:$16 sps:$4 sm:$0xff]  }
 0x14f   :  { %2102 = vmatprep.subr.bf16.mxu1 %v4060_v11  ;;  %v4136_v11 = vld [vmem:[#allocation2 + $0x628] ss:$16 sps:$4 sm:$0xff]  }
 0x151   :  { %2064 = vmatpush2.bf16.msra.mxu0 %v4055_v12  ;;  %v4141_v12 = vld [vmem:[#allocation2 + $0x40c] ss:$16 sps:$4 sm:$0xff]  }
 0x152   :  { %2103 = vmatpush2.bf16.msra.mxu1 %v4058_v13  ;;  %2065 = vmatprep.subr.bf16.mxu0 %v4063_v14  ;;  %v4144_v13 = vld [vmem:[#allocation2 + $0x60c] ss:$16 sps:$4 sm:$0xff]   ;;  %v4139_v14 = vld [vmem:[#allocation2 + $0x408] ss:$16 sps:$4 sm:$0xff]  }
 0x153   :  { %2104 = vmatprep.subr.bf16.mxu1 %v4066_v15  ;;  %v4142_v15 = vld [vmem:[#allocation2 + $0x608] ss:$16 sps:$4 sm:$0xff]  }
 0x155   :  { %2066 = vmatpush2.bf16.msra.mxu0 %v4061_v16  ;;  %v4147_v16 = vld [vmem:[#allocation2 + $0x5ec] ss:$16 sps:$4 sm:$0xff]  }
 0x156   :  { %2105 = vmatpush2.bf16.msra.mxu1 %v4064_v17  ;;  %2067 = vmatprep.subr.bf16.mxu0 %v4069_v19  ;;  %v4150_v17 = vld [vmem:[#allocation2 + $0x7ec] ss:$16 sps:$4 sm:$0xff]   ;;  %v4145_v19 = vld [vmem:[#allocation2 + $0x5e8] ss:$16 sps:$4 sm:$0xff]  }
 0x157   :  { %2106 = vmatprep.subr.bf16.mxu1 %v4072_v21  ;;  %v4148_v21 = vld [vmem:[#allocation2 + $0x7e8] ss:$16 sps:$4 sm:$0xff]  }
 0x159   :  { %2068 = vmatpush2.bf16.msra.mxu0 %v4067_v22  ;;  %v4153_v22 = vld [vmem:[#allocation2 + $0x5cc] ss:$16 sps:$4 sm:$0xff]  }
 0x15a   :  { %2107 = vmatpush2.bf16.msra.mxu1 %v4070_v23  ;;  %2069 = vmatprep.subr.bf16.mxu0 %v4075_v24  ;;  %v4156_v23 = vld [vmem:[#allocation2 + $0x7cc] ss:$16 sps:$4 sm:$0xff]   ;;  %v4151_v24 = vld [vmem:[#allocation2 + $0x5c8] ss:$16 sps:$4 sm:$0xff]  }
 0x15b   :  { %2108 = vmatprep.subr.bf16.mxu1 %v4078_v52  ;;  %v4154_v52 = vld [vmem:[#allocation2 + $0x7c8] ss:$16 sps:$4 sm:$0xff]  }
 0x15d   :  { %2070 = vmatpush2.bf16.msra.mxu0 %v4073_v32  ;;  %v4159_v32 = vld [vmem:[#allocation2 + $0x5ac] ss:$16 sps:$4 sm:$0xff]  }
 0x15e   :  { %2109 = vmatpush2.bf16.msra.mxu1 %v4076_v47  ;;  %2071 = vmatprep.subr.bf16.mxu0 %v4081_v33  ;;  %v4162_v47 = vld [vmem:[#allocation2 + $0x7ac] ss:$16 sps:$4 sm:$0xff]   ;;  %v4157_v33 = vld [vmem:[#allocation2 + $0x5a8] ss:$16 sps:$4 sm:$0xff]  }
 0x15f   :  { %2110 = vmatprep.subr.bf16.mxu1 %v4084_v34  ;;  %v4160_v34 = vld [vmem:[#allocation2 + $0x7a8] ss:$16 sps:$4 sm:$0xff]  }
 0x161   :  { %2072 = vmatpush2.bf16.msra.mxu0 %v4079_v35  ;;  %v4165_v35 = vld [vmem:[#allocation2 + $0x58c] ss:$16 sps:$4 sm:$0xff]  }
 0x162   :  { %2111 = vmatpush2.bf16.msra.mxu1 %v4082_v36  ;;  %2073 = vmatprep.subr.bf16.mxu0 %v4087_v37  ;;  %v4168_v36 = vld [vmem:[#allocation2 + $0x78c] ss:$16 sps:$4 sm:$0xff]   ;;  %v4163_v37 = vld [vmem:[#allocation2 + $0x588] ss:$16 sps:$4 sm:$0xff]  }
 0x163   :  { %2112 = vmatprep.subr.bf16.mxu1 %v4090_v38  ;;  %v4166_v38 = vld [vmem:[#allocation2 + $0x788] ss:$16 sps:$4 sm:$0xff]  }
 0x165   :  { %2074 = vmatpush2.bf16.msra.mxu0 %v4085_v39  ;;  %v4171_v39 = vld [vmem:[#allocation2 + $0x56c] ss:$16 sps:$4 sm:$0xff]  }
 0x166   :  { %2113 = vmatpush2.bf16.msra.mxu1 %v4088_v42  ;;  %2075 = vmatprep.subr.bf16.mxu0 %v4093_v43  ;;  %v4174_v42 = vld [vmem:[#allocation2 + $0x76c] ss:$16 sps:$4 sm:$0xff]   ;;  %v4169_v43 = vld [vmem:[#allocation2 + $0x568] ss:$16 sps:$4 sm:$0xff]  }
 0x167   :  { %2114 = vmatprep.subr.bf16.mxu1 %v4096_v50  ;;  %v4172_v50 = vld [vmem:[#allocation2 + $0x768] ss:$16 sps:$4 sm:$0xff]  }
 0x169   :  { %2076 = vmatpush2.bf16.msra.mxu0 %v4091_v44  ;;  %v4177_v44 = vld [vmem:[#allocation2 + $0x54c] ss:$16 sps:$4 sm:$0xff]  }
 0x16a   :  { %2115 = vmatpush2.bf16.msra.mxu1 %v4094_v46  ;;  %2123 = vmatprep.subr.bf16.mxu0 %v4099_v54  ;;  %v4180_v46 = vld [vmem:[#allocation2 + $0x74c] ss:$16 sps:$4 sm:$0xff]   ;;  %v4175_v54 = vld [vmem:[#allocation2 + $0x548] ss:$16 sps:$4 sm:$0xff]  }
 0x16b   :  { %2162 = vmatprep.subr.bf16.mxu1 %v4102_v45  ;;  %v4178_v45 = vld [vmem:[#allocation2 + $0x748] ss:$16 sps:$4 sm:$0xff]  }
 0x16c   :  { %2078 = vmatmul.mubr.f32.vlgmr.msra.gmra.mxu0 %v323_v53  ;;  %v4120_v53 = vld [vmem:[#allocation2 + $0x68c] ss:$16 sps:$4 sm:$0xff]  }
 0x16d   :  { %2117 = vmatmul.mubr.f32.vlgmr.msra.gmra.mxu1 %v325_v49  ;;  %2124 = vmatpush1.bf16.msra.mxu0 %v4097_v48  ;;  %v4117_v49 = vld [vmem:[#allocation2 + $0x48c] ss:$16 sps:$4 sm:$0xff]  }
 0x16e   :  { %2155 = vmatprep.mubr.f32.mxu0 %v328_v63  ;;  %2163 = vmatpush1.bf16.msra.mxu1 %v4100_v51  ;;  %v4118_v63 = vld [vmem:[#allocation2 + $0x688] ss:$16 sps:$4 sm:$0xff]   ;;  %v4183_v48 = vld [vmem:[#allocation2 + $0x52c] ss:$16 sps:$4 sm:$0xff]  }
 0x16f   :  { %2194 = vmatprep.mubr.f32.mxu1 %v330_v3  ;;  %2125 = vmatprep.subr.bf16.mxu0 %v4105_v55  ;;  %v4121_v3 = vld [vmem:[#allocation2 + $0x468] ss:$16 sps:$4 sm:$0xff]   ;;  %v4186_v51 = vld [vmem:[#allocation2 + $0x72c] ss:$16 sps:$4 sm:$0xff]  }
 0x170   :  { %2164 = vmatprep.subr.bf16.mxu1 %v4108_v56  ;;  %v4181_v55 = vld [vmem:[#allocation2 + $0x528] ss:$16 sps:$4 sm:$0xff]  }
 0x171   :  { %2126 = vmatpush1.bf16.msra.mxu0 %v4103_v57  ;;  %v4184_v56 = vld [vmem:[#allocation2 + $0x728] ss:$16 sps:$4 sm:$0xff]   ;;  %v4189_v57 = vld [vmem:[#allocation2 + $0x50c] ss:$16 sps:$4 sm:$0xff]  }
 0x172   :  { %2165 = vmatpush1.bf16.msra.mxu1 %v4106_v58  ;;  %2127 = vmatprep.subr.bf16.mxu0 %v4111_v60  ;;  %v4192_v58 = vld [vmem:[#allocation2 + $0x70c] ss:$16 sps:$4 sm:$0xff]   ;;  %v4187_v60 = vld [vmem:[#allocation2 + $0x508] ss:$16 sps:$4 sm:$0xff]  }
 0x173   :  { %2166 = vmatprep.subr.bf16.mxu1 %v4114_v62  ;;  %v4190_v62 = vld [vmem:[#allocation2 + $0x708] ss:$16 sps:$4 sm:$0xff]  }
 0x175   :  { %2128 = vmatpush1.bf16.msra.mxu0 %v4109_v40  ;;  %v4195_v40 = vld [vmem:[#allocation4 + $0x74] ss:$8 sps:$4 sm:$0xff]  }
 0x176   :  { %2167 = vmatpush1.bf16.msra.mxu1 %v4112_v41  ;;  %2129 = vmatprep.subr.bf16.mxu0 %v4117_v49  ;;  %v4193_v41 = vld [vmem:[#allocation4 + $0x70] ss:$8 sps:$4 sm:$0xff]   ;;  %v4198_v49 = vld [vmem:[#allocation4 + $0x64] ss:$8 sps:$4 sm:$0xff]  }
 0x177   :  { %2168 = vmatprep.subr.bf16.mxu1 %v4120_v53  ;;  %v4196_v53 = vld [vmem:[#allocation4 + $0x60] ss:$8 sps:$4 sm:$0xff]  }
 0x179   :  { %2130 = vmatpush1.bf16.msra.mxu0 %v4115_v59  ;;  %v4201_v59 = vld [vmem:[#allocation4 + $0x54] ss:$8 sps:$4 sm:$0xff]  }
 0x17a   :  { %2169 = vmatpush1.bf16.msra.mxu1 %v4118_v63  ;;  %2131 = vmatprep.subr.bf16.mxu0 %v4123_v1  ;;  %v4199_v63 = vld [vmem:[#allocation4 + $0x50] ss:$8 sps:$4 sm:$0xff]  }
 0x17b   :  { %2170 = vmatprep.subr.bf16.mxu1 %v4126_v61  ;;  %v4241_v1 = vld [vmem:[#allocation4 + $0x170] ss:$8 sps:$4 sm:$0xff]   ;;  %v4243_v61 = vld [vmem:[#allocation4 + $0x174] ss:$8 sps:$4 sm:$0xff]  }
 0x17d   :  { %2132 = vmatpush1.bf16.msra.mxu0 %v4121_v3  ;;  %v4204_v3 = vld [vmem:[#allocation4 + $0x44] ss:$8 sps:$4 sm:$0xff]  }
 0x17e   :  { %2171 = vmatpush1.bf16.msra.mxu1 %v4124_v2  ;;  %2133 = vmatprep.subr.bf16.mxu0 %v4129_v4  ;;  %v4246_v2 = vld [vmem:[#allocation4 + $0x164] ss:$8 sps:$4 sm:$0xff]   ;;  %v4244_v4 = vld [vmem:[#allocation4 + $0x160] ss:$8 sps:$4 sm:$0xff]  }
 0x17f   :  { %2172 = vmatprep.subr.bf16.mxu1 %v4132_v5  ;;  %v4205_v5 = vld [vmem:[#allocation4 + $0x30] ss:$8 sps:$4 sm:$0xff]  }
 0x181   :  { %2134 = vmatpush1.bf16.msra.mxu0 %v4127_v6  ;;  %v4252_v6 = vld [vmem:[#allocation4 + $0x144] ss:$8 sps:$4 sm:$0xff]  }
 0x182   :  { %2173 = vmatpush1.bf16.msra.mxu1 %v4130_v7  ;;  %2135 = vmatprep.subr.bf16.mxu0 %v4135_v8  ;;  %v4210_v7 = vld [vmem:[#allocation4 + $0x24] ss:$8 sps:$4 sm:$0xff]   ;;  %v4250_v8 = vld [vmem:[#allocation4 + $0x140] ss:$8 sps:$4 sm:$0xff]  }
 0x183   :  { %2174 = vmatprep.subr.bf16.mxu1 %v4138_v9  ;;  %v4208_v9 = vld [vmem:[#allocation4 + $0x20] ss:$8 sps:$4 sm:$0xff]  }
 0x185   :  { %2136 = vmatpush1.bf16.msra.mxu0 %v4133_v10  ;;  %v4255_v10 = vld [vmem:[#allocation4 + $0x134] ss:$8 sps:$4 sm:$0xff]  }
 0x186   :  { %2175 = vmatpush1.bf16.msra.mxu1 %v4136_v11  ;;  %2137 = vmatprep.subr.bf16.mxu0 %v4141_v12  ;;  %v4213_v11 = vld [vmem:[#allocation4 + $0x14] ss:$8 sps:$4 sm:$0xff]   ;;  %v4253_v12 = vld [vmem:[#allocation4 + $0x130] ss:$8 sps:$4 sm:$0xff]  }
 0x187   :  { %2176 = vmatprep.subr.bf16.mxu1 %v4144_v13  ;;  %v4211_v13 = vld [vmem:[#allocation4 + $0x10] ss:$8 sps:$4 sm:$0xff]  }
 0x189   :  { %2138 = vmatpush1.bf16.msra.mxu0 %v4139_v14  ;;  %v4258_v14 = vld [vmem:[#allocation4 + $0x124] ss:$8 sps:$4 sm:$0xff]  }
 0x18a   :  { %2177 = vmatpush1.bf16.msra.mxu1 %v4142_v15  ;;  %2139 = vmatprep.subr.bf16.mxu0 %v4147_v16  ;;  %v4216_v15 = vld [vmem:[#allocation4 + $0x4] ss:$8 sps:$4 sm:$0xff]   ;;  %v4256_v16 = vld [vmem:[#allocation4 + $0x120] ss:$8 sps:$4 sm:$0xff]  }
 0x18b   :  { %2178 = vmatprep.subr.bf16.mxu1 %v4150_v17  ;;  %v4214_v17 = vld [vmem:[#allocation4] ss:$8 sps:$4 sm:$0xff]  }
 0x18d   :  { %2140 = vmatpush2.bf16.msra.mxu0 %v4145_v19  ;;  %v4261_v19 = vld [vmem:[#allocation4 + $0x114] ss:$8 sps:$4 sm:$0xff]  }
 0x18e   :  { %2179 = vmatpush2.bf16.msra.mxu1 %v4148_v21  ;;  %2141 = vmatprep.subr.bf16.mxu0 %v4153_v22  ;;  %v4219_v21 = vld [vmem:[#allocation4 + $0xf4] ss:$8 sps:$4 sm:$0xff]   ;;  %v4259_v22 = vld [vmem:[#allocation4 + $0x110] ss:$8 sps:$4 sm:$0xff]  }
 0x18f   :  { %2180 = vmatprep.subr.bf16.mxu1 %v4156_v23  ;;  %v4217_v23 = vld [vmem:[#allocation4 + $0xf0] ss:$8 sps:$4 sm:$0xff]  }
 0x191   :  { %2142 = vmatpush2.bf16.msra.mxu0 %v4151_v24  ;;  %v4264_v24 = vld [vmem:[#allocation4 + $0x104] ss:$8 sps:$4 sm:$0xff]  }
 0x192   :  { %2181 = vmatpush2.bf16.msra.mxu1 %v4154_v52  ;;  %2143 = vmatprep.subr.bf16.mxu0 %v4159_v32  ;;  %v4222_v52 = vld [vmem:[#allocation4 + $0xe4] ss:$8 sps:$4 sm:$0xff]   ;;  %v4262_v32 = vld [vmem:[#allocation4 + $0x100] ss:$8 sps:$4 sm:$0xff]  }
 0x193   :  { %2182 = vmatprep.subr.bf16.mxu1 %v4162_v47  ;;  %v4220_v47 = vld [vmem:[#allocation4 + $0xe0] ss:$8 sps:$4 sm:$0xff]  }
 0x195   :  { %2144 = vmatpush2.bf16.msra.mxu0 %v4157_v33  ;;  %v4267_v33 = vld [vmem:[#allocation4 + $0x1f4] ss:$8 sps:$4 sm:$0xff]  }
 0x196   :  { %2183 = vmatpush2.bf16.msra.mxu1 %v4160_v34  ;;  %2145 = vmatprep.subr.bf16.mxu0 %v4165_v35  ;;  %v4225_v34 = vld [vmem:[#allocation4 + $0xd4] ss:$8 sps:$4 sm:$0xff]   ;;  %v4265_v35 = vld [vmem:[#allocation4 + $0x1f0] ss:$8 sps:$4 sm:$0xff]  }
 0x197   :  { %2184 = vmatprep.subr.bf16.mxu1 %v4168_v36  ;;  %v4223_v36 = vld [vmem:[#allocation4 + $0xd0] ss:$8 sps:$4 sm:$0xff]  }
 0x199   :  { %2146 = vmatpush2.bf16.msra.mxu0 %v4163_v37  ;;  %v4270_v37 = vld [vmem:[#allocation4 + $0x1e4] ss:$8 sps:$4 sm:$0xff]  }
 0x19a   :  { %2185 = vmatpush2.bf16.msra.mxu1 %v4166_v38  ;;  %2147 = vmatprep.subr.bf16.mxu0 %v4171_v39  ;;  %v4228_v38 = vld [vmem:[#allocation4 + $0xc4] ss:$8 sps:$4 sm:$0xff]   ;;  %v4268_v39 = vld [vmem:[#allocation4 + $0x1e0] ss:$8 sps:$4 sm:$0xff]  }
 0x19b   :  { %2186 = vmatprep.subr.bf16.mxu1 %v4174_v42  ;;  %v4226_v42 = vld [vmem:[#allocation4 + $0xc0] ss:$8 sps:$4 sm:$0xff]  }
 0x19d   :  { %2148 = vmatpush2.bf16.msra.mxu0 %v4169_v43  ;;  %v4273_v43 = vld [vmem:[#allocation4 + $0x1d4] ss:$8 sps:$4 sm:$0xff]  }
 0x19e   :  { %2187 = vmatpush2.bf16.msra.mxu1 %v4172_v50  ;;  %2149 = vmatprep.subr.bf16.mxu0 %v4177_v44  ;;  %v4231_v50 = vld [vmem:[#allocation4 + $0xb4] ss:$8 sps:$4 sm:$0xff]   ;;  %v4271_v44 = vld [vmem:[#allocation4 + $0x1d0] ss:$8 sps:$4 sm:$0xff]  }
 0x19f   :  { %2188 = vmatprep.subr.bf16.mxu1 %v4180_v46  ;;  %v4229_v46 = vld [vmem:[#allocation4 + $0xb0] ss:$8 sps:$4 sm:$0xff]  }
 0x1a1   :  { %2150 = vmatpush2.bf16.msra.mxu0 %v4175_v54  ;;  %v4276_v54 = vld [vmem:[#allocation4 + $0x1c4] ss:$8 sps:$4 sm:$0xff]  }
 0x1a2   :  { %2189 = vmatpush2.bf16.msra.mxu1 %v4178_v45  ;;  %2151 = vmatprep.subr.bf16.mxu0 %v4183_v48  ;;  %v4234_v45 = vld [vmem:[#allocation4 + $0xa4] ss:$8 sps:$4 sm:$0xff]   ;;  %v4274_v48 = vld [vmem:[#allocation4 + $0x1c0] ss:$8 sps:$4 sm:$0xff]  }
 0x1a3   :  { %2190 = vmatprep.subr.bf16.mxu1 %v4186_v51  ;;  %v4232_v51 = vld [vmem:[#allocation4 + $0xa0] ss:$8 sps:$4 sm:$0xff]  }
 0x1a5   :  { %2152 = vmatpush2.bf16.msra.mxu0 %v4181_v55  ;;  %v4279_v55 = vld [vmem:[#allocation4 + $0x1b4] ss:$8 sps:$4 sm:$0xff]  }
 0x1a6   :  { %2191 = vmatpush2.bf16.msra.mxu1 %v4184_v56  ;;  %2153 = vmatprep.subr.bf16.mxu0 %v4189_v57  ;;  %v4237_v56 = vld [vmem:[#allocation4 + $0x94] ss:$8 sps:$4 sm:$0xff]   ;;  %v4544_v57 = vld [vmem:[%s4775_s6 + $0x8] sm:$0xf] }
 0x1a7   :  { %2192 = vmatprep.subr.bf16.mxu1 %v4192_v58  ;;  %v4277_v58 = vld [vmem:[#allocation4 + $0x1b0] ss:$8 sps:$4 sm:$0xff]  }
 0x1a9   :  { %2154 = vmatpush2.bf16.msra.mxu0 %v4187_v60  ;;  %v4235_v60 = vld [vmem:[#allocation4 + $0x90] ss:$8 sps:$4 sm:$0xff]  }
 0x1aa   :  { %2193 = vmatpush2.bf16.msra.mxu1 %v4190_v62  ;;  %2601 = vmatprep.subr.bf16.mxu0 %v4195_v40  ;;  %v4282_v62 = vld [vmem:[#allocation4 + $0x1a4] ss:$8 sps:$4 sm:$0xff]  }
 0x1ab   :  { %2640 = vmatprep.subr.bf16.mxu1 %v4243_v61 }
 0x1ac   :  { %2156 = vmatmul.mubr.f32.vlgmr.msra.gmra.mxu0 %v327_v25  ;;  %v4249_v25 = vld [vmem:[#allocation4 + $0x154] ss:$8 sps:$4 sm:$0xff]   ;;  %v1923_v40 = vpop.f32.mrf.mxu0 }
 0x1ad   :  { %2195 = vmatmul.mubr.f32.vlgmr.msra.gmra.mxu1 %v329_v29  ;;  %2602 = vmatpush1.bf16.msra.mxu0 %v4193_v41  ;;  %v4247_v29 = vld [vmem:[#allocation4 + $0x150] ss:$8 sps:$4 sm:$0xff]   ;;  %v4240_v41 = vld [vmem:[#allocation4 + $0x84] ss:$8 sps:$4 sm:$0xff]  }
 0x1ae   :  { %2603 = vmatprep.subr.bf16.mxu0 %v4198_v49  ;;  %2641 = vmatpush1.bf16.msra.mxu1 %v4241_v1  ;;  %v592_v49 = vrot.slane %v4544_v57, %v4449_v27  ;;  %v1925_v1 = vpop.f32.mrf.mxu0 }
 0x1af   :  { %2642 = vmatprep.subr.bf16.mxu1 %v4246_v2 }
 0x1b0   :  { %v1924_v61 = vadd.f32 %v1923_v40, %v592_v49  ;;  %v2870_v49 = vld [vmem:[%s4774_s5 + $0x78] sm:$0xff] }
 0x1b1   :  { %2604 = vmatpush1.bf16.msra.mxu0 %v4196_v53  ;;  %v4280_v53 = vld [vmem:[#allocation4 + $0x1a0] ss:$8 sps:$4 sm:$0xff]  }
 0x1b2   :  { %2605 = vmatprep.subr.bf16.mxu0 %v4201_v59  ;;  %2643 = vmatpush1.bf16.msra.mxu1 %v4244_v4  ;;  %v596_v59 = vrot.slane %v4544_v57, %v4458_v30 }
 0x1b3   :  { %2644 = vmatprep.subr.bf16.mxu1 %v4249_v25 }
 0x1b4   :  { %v1926_v2 = vadd.f32 %v1925_v1, %v596_v59  ;;  %v2868_v59 = vld [vmem:[%s4774_s5 + $0x68] sm:$0xff]  ;;  %v2866_v1 = vld [vmem:[%s4774_s5 + $0x58] sm:$0xff] }
 0x1b5   :  { %2606 = vmatpush1.bf16.msra.mxu0 %v4199_v63  ;;  %v4238_v63 = vld [vmem:[#allocation4 + $0x80] ss:$8 sps:$4 sm:$0xff]  }
 0x1b6   :  { %2607 = vmatprep.subr.bf16.mxu0 %v4204_v3  ;;  %2645 = vmatpush1.bf16.msra.mxu1 %v4247_v29  ;;  %v1962_v3 = vpop.f32.mrf.mxu1 }
 0x1b7   :  { %2646 = vmatprep.subr.bf16.mxu1 %v4252_v6  ;;  %v1963_v4 = vadd.f32 %v1962_v3, %v1924_v61  ;;  %v2865_v61 = vld [vmem:[%s4774_s5 + $0x50] sm:$0xff]  ;;  %v2864_v3 = vld [vmem:[%s4774_s5 + $0x48] sm:$0xff] }
 0x1b9   :  { %2608 = vmatpush1.bf16.msra.mxu0 %v4202_v20  ;;  %v1964_v20 = vpop.f32.mrf.mxu1 }
 0x1ba   :  { %2609 = vmatprep.subr.bf16.mxu0 %v4207_v18  ;;  %2647 = vmatpush1.bf16.msra.mxu1 %v4250_v8  ;;  %v1965_v18 = vadd.f32 %v1964_v20, %v1926_v2  ;;  %v2863_v2 = vld [vmem:[%s4774_s5 + $0x40] sm:$0xff]  ;;  %v2861_v20 = vld [vmem:[%s4774_s5 + $0x30] sm:$0xff] }
 0x1bb   :  { %2648 = vmatprep.subr.bf16.mxu1 %v4255_v10 }
 0x1bd   :  { %2610 = vmatpush1.bf16.msra.mxu0 %v4205_v5 }
 0x1be   :  { %2611 = vmatprep.subr.bf16.mxu0 %v4210_v7  ;;  %2649 = vmatpush1.bf16.msra.mxu1 %v4253_v12  ;;  %v4285_v7 = vld [vmem:[#allocation4 + $0x194] ss:$8 sps:$4 sm:$0xff]  }
 0x1bf   :  { %2650 = vmatprep.subr.bf16.mxu1 %v4258_v14 }
 0x1c1   :  { %2612 = vmatpush1.bf16.msra.mxu0 %v4208_v9  ;;  %v4283_v9 = vld [vmem:[#allocation4 + $0x190] ss:$8 sps:$4 sm:$0xff]  }
 0x1c2   :  { %2613 = vmatprep.subr.bf16.mxu0 %v4213_v11  ;;  %2651 = vmatpush1.bf16.msra.mxu1 %v4256_v16 }
 0x1c3   :  { %2652 = vmatprep.subr.bf16.mxu1 %v4261_v19  ;;  %v4290_v19 = vld [vmem:[%s4773_s4 + $0x38] sm:$0xff]  }
 0x1c5   :  { %2614 = vmatpush1.bf16.msra.mxu0 %v4211_v13  ;;  %v4288_v13 = vld [vmem:[#allocation4 + $0x184] ss:$8 sps:$4 sm:$0xff]  }
 0x1c6   :  { %2615 = vmatprep.subr.bf16.mxu0 %v4216_v15  ;;  %2653 = vmatpush1.bf16.msra.mxu1 %v4259_v22  ;;  %v4286_v15 = vld [vmem:[#allocation4 + $0x180] ss:$8 sps:$4 sm:$0xff]   ;;  %v4292_v22 = vld [vmem:[%s4773_s4 + $0x30] sm:$0xff]  }
 0x1c7   :  { %2654 = vmatprep.subr.bf16.mxu1 %v4264_v24  ;;  %v4294_v24 = vld [vmem:[%s4773_s4 + $0x28] sm:$0xff]  }
 0x1c9   :  { %2616 = vmatpush1.bf16.msra.mxu0 %v4214_v17  ;;  %v4289_v17 = vld [vmem:[%s4773_s4 + $0x78] sm:$0xff]  }
 0x1ca   :  { %2617 = vmatprep.subr.bf16.mxu0 %v4219_v21  ;;  %2655 = vmatpush1.bf16.msra.mxu1 %v4262_v32  ;;  %v4291_v21 = vld [vmem:[%s4773_s4 + $0x70] sm:$0xff]   ;;  %v4296_v32 = vld [vmem:[%s4773_s4 + $0x20] sm:$0xff]  }
 0x1cb   :  { %2656 = vmatprep.subr.bf16.mxu1 %v4267_v33  ;;  %v4298_v33 = vld [vmem:[%s4773_s4 + $0x18] sm:$0xff]  }
 0x1cd   :  { %2618 = vmatpush2.bf16.msra.mxu0 %v4217_v23  ;;  %v4293_v23 = vld [vmem:[%s4773_s4 + $0x68] sm:$0xff]  }
 0x1ce   :  { %2619 = vmatprep.subr.bf16.mxu0 %v4222_v52  ;;  %2657 = vmatpush2.bf16.msra.mxu1 %v4265_v35  ;;  %v4295_v52 = vld [vmem:[%s4773_s4 + $0x60] sm:$0xff]   ;;  %v4300_v35 = vld [vmem:[%s4773_s4 + $0x10] sm:$0xff]  }
 0x1cf   :  { %2658 = vmatprep.subr.bf16.mxu1 %v4270_v37  ;;  %v600_v37 = vrot.slane %v4544_v57, %v76_v28 }
 0x1d1   :  { %2620 = vmatpush2.bf16.msra.mxu0 %v4220_v47  ;;  %v4297_v47 = vld [vmem:[%s4773_s4 + $0x58] sm:$0xff]  }
 0x1d2   :  { %2621 = vmatprep.subr.bf16.mxu0 %v4225_v34  ;;  %2659 = vmatpush2.bf16.msra.mxu1 %v4268_v39  ;;  %v4299_v34 = vld [vmem:[%s4773_s4 + $0x50] sm:$0xff]  }
 0x1d3   :  { %2660 = vmatprep.subr.bf16.mxu1 %v4273_v43 }
 0x1d5   :  { %2622 = vmatpush2.bf16.msra.mxu0 %v4223_v36 }
 0x1d6   :  { %2623 = vmatprep.subr.bf16.mxu0 %v4228_v38  ;;  %2661 = vmatpush2.bf16.msra.mxu1 %v4271_v44  ;;  %v604_v38 = vrot.slane %v4544_v57, %v80_v31  ;;  %v4302_v31 = vld [vmem:[%s4773_s4 + $0x8] sm:$0xff]   ;;  %v4303_v57 = vld [vmem:[%s4773_s4 + $0x40] sm:$0xff]  }
 0x1d7   :  { %2662 = vmatprep.subr.bf16.mxu1 %v4276_v54 }
 0x1d9   :  { %2624 = vmatpush2.bf16.msra.mxu0 %v4226_v42 }
 0x1da   :  { %2625 = vmatprep.subr.bf16.mxu0 %v4231_v50  ;;  %2663 = vmatpush2.bf16.msra.mxu1 %v4274_v48 }
 0x1db   :  { %2664 = vmatprep.subr.bf16.mxu1 %v4279_v55 }
 0x1dd   :  { %2626 = vmatpush2.bf16.msra.mxu0 %v4229_v46 }
 0x1de   :  { %2627 = vmatprep.subr.bf16.mxu0 %v4234_v45  ;;  %2665 = vmatpush2.bf16.msra.mxu1 %v4277_v58 }
 0x1df   :  { %2666 = vmatprep.subr.bf16.mxu1 %v4282_v62 }
 0x1e1   :  { %2628 = vmatpush2.bf16.msra.mxu0 %v4232_v51 }
 0x1e2   :  { %2629 = vmatprep.subr.bf16.mxu0 %v4237_v56  ;;  %2667 = vmatpush2.bf16.msra.mxu1 %v4280_v53  ;;  %v2869_v53 = vld [vmem:[%s4774_s5 + $0x70] sm:$0xff] }
 0x1e3   :  { %2668 = vmatprep.subr.bf16.mxu1 %v4285_v7 }
 0x1e5   :  { %2630 = vmatpush2.bf16.msra.mxu0 %v4235_v60 }
 0x1e6   :  { %2631 = vmatprep.subr.bf16.mxu0 %v4240_v41  ;;  %2669 = vmatpush2.bf16.msra.mxu1 %v4283_v9  ;;  %v4304_v41 = vld [vmem:[%s4773_s4] sm:$0xff]  }
 0x1e7   :  { %2670 = vmatprep.subr.bf16.mxu1 %v4288_v13 }
 0x1e9   :  { %2632 = vmatpush2.bf16.msra.mxu0 %v4238_v63  ;;  %v2867_v63 = vld [vmem:[%s4774_s5 + $0x60] sm:$0xff] }
 0x1ea   :  { %2671 = vmatpush2.bf16.msra.mxu1 %v4286_v15  ;;  %3666 = vmatprep.subr.bf16.mxu0 %v4289_v17  ;;  %v2856_v17 = vld [vmem:[%s4774_s5 + $0x8] sm:$0xff] }
 0x1eb   :  { %3722 = vmatprep.subr.mxu1 %v4355_v0 }
 0x1ec   :  { %v2001_v25 = vpop.f32.mrf.mxu0  ;;  %v2040_v5 = vpop.f32.mrf.mxu1 }
 0x1ed   :  { %v2002_v29 = vadd.f32 %v2001_v25, %v1963_v4  ;;  %v2862_v4 = vld [vmem:[%s4774_s5 + $0x38] sm:$0xff]  ;;  %v2860_v25 = vld [vmem:[%s4774_s5 + $0x28] sm:$0xff] }
 0x1ee   :  { %v2003_v6 = vpop.f32.mrf.mxu0  ;;  %v2042_v11 = vpop.f32.mrf.mxu1 }
 0x1ef   :  { %v2004_v8 = vadd.f32 %v2003_v6, %v1965_v18  ;;  %v2041_v10 = vadd.f32 %v2040_v5, %v2002_v29  ;;  %v2269_v18 = vld [vmem:[%s4775_s6 + $0xc] sm:$0x3] }
 0x1f0   :  { %v2274_v5 = vrot.slane %v2269_v18, %v4449_v27  ;;  %v2278_v6 = vrot.slane %v2269_v18, %v4458_v30  ;;  %v2858_v27 = vld [vmem:[%s4774_s5 + $0x18] sm:$0xff]  ;;  %v2857_v30 = vld [vmem:[%s4774_s5 + $0x10] sm:$0xff] }
 0x1f1   :  { %v2043_v12 = vadd.f32 %v2042_v11, %v2004_v8  ;;  %v2201_v16 = vmax.f32 %v2041_v10, 0.0 }
 0x1f3   :  { %v2202_v14 = vmax.f32 %v2043_v12, 0.0 }
 0x1f5   :  { %2633 = vmatprep.mubr.f32.mxu0 %v2202_v14 }
 0x1f6   :  { %2634 = vmatmul.mubr.f32.vlgmr.msra.gmra.mxu0 %v2201_v16  ;;  %v2859_v16 = vld [vmem:[%s4774_s5 + $0x20] sm:$0xff] }
 0x1f7   :  { %3667 = vmatpush3.bf16.msra.mxu0 %v4290_v19  ;;  %v2855_v19 = vld [vmem:[%s4774_s5] sm:$0xff] }
 0x1f8   :  { %3668 = vmatprep.subr.bf16.mxu0 %v4291_v21  ;;  %v2956_v21 = vld [vmem:[%s4774_s5 + $0xb8] sm:$0xff] }
 0x1fb   :  { %3669 = vmatpush3.bf16.msra.mxu0 %v4292_v22  ;;  %v2955_v22 = vld [vmem:[%s4774_s5 + $0xb0] sm:$0xff] }
 0x1fc   :  { %3670 = vmatprep.subr.bf16.mxu0 %v4293_v23  ;;  %v2954_v23 = vld [vmem:[%s4774_s5 + $0xa8] sm:$0xff] }
 0x1ff   :  { %3671 = vmatpush3.bf16.msra.mxu0 %v4294_v24  ;;  %v2953_v24 = vld [vmem:[%s4774_s5 + $0xa0] sm:$0xff] }
 0x200   :  { %3672 = vmatprep.subr.bf16.mxu0 %v4295_v52  ;;  %v2952_v52 = vld [vmem:[%s4774_s5 + $0x98] sm:$0xff] }
 0x203   :  { %3673 = vmatpush3.bf16.msra.mxu0 %v4296_v32 }
 0x204   :  { %3674 = vmatprep.subr.bf16.mxu0 %v4297_v47  ;;  %v3639_v47 = vld [vmem:[%s4775_s6 + $0xe] ss:$0 sm:$0xff] }
 0x207   :  { %3675 = vmatpush3.bf16.msra.mxu0 %v4298_v33 }
 0x208   :  { %3676 = vmatprep.subr.bf16.mxu0 %v4299_v34 }
 0x20b   :  { %3677 = vmatpush3.bf16.msra.mxu0 %v4300_v35 }
 0x20c   :  { %3678 = vmatprep.subr.bf16.mxu0 %v4301_v26  ;;  %v3659_v26 = vld [vmem:[%s4775_s6 + $0x11] ss:$0 sm:$0xff] }
 0x20f   :  { %3679 = vmatpush3.bf16.msra.mxu0 %v4302_v31 }
 0x210   :  { %3680 = vmatprep.subr.bf16.mxu0 %v4303_v57 }
 0x213   :  { %3681 = vmatpush3.bf16.msra.mxu0 %v4304_v41 }
 0x214   :  { %3757 = vmatprep.subr.mxu0 %v4355_v0 }
 0x22c   :  { %v2079_v36 = vpop.f32.mrf.mxu0 }
 0x22d   :  { %v2080_v42 = vadd.f32 %v2079_v36, %v600_v37  ;;  %v2118_v43 = vpop.f32.mrf.mxu1  ;;  %v2951_v37 = vld [vmem:[%s4774_s5 + $0x90] sm:$0xff] }
 0x22e   :  { %v2081_v39 = vpop.f32.mrf.mxu0 }
 0x22f   :  { %v2082_v50 = vadd.f32 %v2081_v39, %v604_v38  ;;  %v2119_v44 = vadd.f32 %v2118_v43, %v2080_v42  ;;  %v2120_v46 = vpop.f32.mrf.mxu1  ;;  %v2950_v38 = vld [vmem:[%s4774_s5 + $0x88] sm:$0xff]  ;;  %v2949_v39 = vld [vmem:[%s4774_s5 + $0x80] sm:$0xff]  ;;  %v3042_v42 = vld [vmem:[%s4774_s5 + $0xd8] sm:$0xff] }
 0x230   :  { %v3656_v43 = vld [vmem:[%s4775_s6 + $0xf] ss:$0 sm:$0xff] }
 0x231   :  { %v2121_v45 = vadd.f32 %v2120_v46, %v2082_v50 }
 0x26c   :  { %v2157_v54 = vpop.f32.mrf.mxu0 }
 0x26d   :  { %v2158_v48 = vadd.f32 %v2157_v54, %v2119_v44  ;;  %v2196_v51 = vpop.f32.mrf.mxu1 }
 0x26e   :  { %v2159_v55 = vpop.f32.mrf.mxu0 }
 0x26f   :  { %v2160_v56 = vadd.f32 %v2159_v55, %v2121_v45  ;;  %v2197_v58 = vadd.f32 %v2196_v51, %v2158_v48  ;;  %v2198_v60 = vpop.f32.mrf.mxu1  ;;  %v3041_v45 = vld [vmem:[%s4774_s5 + $0xd0] sm:$0xff]  ;;  %v3040_v48 = vld [vmem:[%s4774_s5 + $0xc8] sm:$0xff]  ;;  %v3039_v51 = vld [vmem:[%s4774_s5 + $0xc0] sm:$0xff] }
 0x270   :  { %v3657_v55 = vld [vmem:[%s4775_s6 + $0x10] ss:$0 sm:$0xff] }
 0x271   :  { %v2199_v62 = vadd.f32 %v2198_v60, %v2160_v56  ;;  %v2203_v40 = vmax.f32 %v2197_v58, 0.0 }
 0x273   :  { %v2204_v28 = vmax.f32 %v2199_v62, 0.0 }
 0x275   :  { %2672 = vmatprep.mubr.f32.mxu1 %v2204_v28  ;;  %v3126_v28 = vld [vmem:[%s4774_s5 + $0xe8] sm:$0xff] }
 0x276   :  { %2673 = vmatmul.mubr.f32.vlgmr.msra.gmra.mxu1 %v2203_v40  ;;  %v3125_v40 = vld [vmem:[%s4774_s5 + $0xe0] sm:$0xff] }
 0x277   :  { %3723 = vmatpush3.msra.mxu1 %v2870_v49  ;;  %3754 = vmatprep.mubr.msk.f32.mxu1 %vm4356_vm2, %v4355_v0 }
 0x278   :  { %3724 = vmatprep.subr.mxu1 %v4355_v0 }
 0x279   :  { %3725 = vmatpush3.msra.mxu1 %v2869_v53  ;;  %v3210_v53 = vld [vmem:[%s4774_s5 + $0xf8] sm:$0xf] }
 0x27a   :  { %3726 = vmatprep.subr.mxu1 %v4355_v0 }
 0x27b   :  { %3727 = vmatpush3.msra.mxu1 %v2868_v59  ;;  %v3209_v59 = vld [vmem:[%s4774_s5 + $0xf0] sm:$0xff] }
 0x27c   :  { %3728 = vmatprep.subr.mxu1 %v4355_v0 }
 0x27d   :  { %3729 = vmatpush3.msra.mxu1 %v2867_v63  ;;  %v3661_v63 = vld [vmem:[%s4775_s6 + $0x12] ss:$0 sm:$0xff] }
 0x27e   :  { %3730 = vmatprep.subr.mxu1 %v4355_v0 }
 0x27f   :  { %3731 = vmatpush3.msra.mxu1 %v2866_v1 }
 0x280   :  { %3732 = vmatprep.subr.mxu1 %v4355_v0 }
 0x281   :  { %3733 = vmatpush3.msra.mxu1 %v2865_v61 }
 0x282   :  { %3734 = vmatprep.subr.mxu1 %v4355_v0 }
 0x283   :  { %3735 = vmatpush3.msra.mxu1 %v2864_v3 }
 0x284   :  { %3736 = vmatprep.subr.mxu1 %v4355_v0 }
 0x285   :  { %3737 = vmatpush3.msra.mxu1 %v2863_v2 }
 0x286   :  { %3738 = vmatprep.subr.mxu1 %v4355_v0 }
 0x287   :  { %3739 = vmatpush3.msra.mxu1 %v2862_v4  ;;  %v3663_v4 = vld [vmem:[%s4775_s6 + $0x13] ss:$0 sm:$0xff] }
 0x288   :  { %3740 = vmatprep.subr.mxu1 %v4355_v0 }
 0x289   :  { %3741 = vmatpush3.msra.mxu1 %v2861_v20 }
 0x28a   :  { %3742 = vmatprep.subr.mxu1 %v4355_v0 }
 0x28b   :  { %3743 = vmatpush3.msra.mxu1 %v2860_v25 }
 0x28c   :  { %3744 = vmatprep.subr.mxu1 %v4355_v0 }
 0x28d   :  { %3745 = vmatpush3.msra.mxu1 %v2859_v16 }
 0x28e   :  { %3746 = vmatprep.subr.mxu1 %v4355_v0 }
 0x28f   :  { %3747 = vmatpush3.msra.mxu1 %v2858_v27 }
 0x290   :  { %3748 = vmatprep.subr.mxu1 %v4355_v0 }
 0x291   :  { %3749 = vmatpush3.msra.mxu1 %v2857_v30 }
 0x292   :  { %3750 = vmatprep.subr.mxu1 %v4355_v0 }
 0x293   :  { %3751 = vmatpush3.msra.mxu1 %v2856_v17 }
 0x294   :  { %3752 = vmatprep.subr.mxu1 %v4355_v0 }
 0x295   :  { %3753 = vmatpush3.msra.mxu1 %v2855_v19 }
 0x296   :  { %3776 = vmatprep.subr.mxu1 %v4355_v0 }
 0x2b6   :  { %v2635_v29 = vpop.f32.mrf.mxu0 }
 0x2b7   :  { %v2636_v8 = vadd.f32 %v2635_v29, %v2274_v5 }
 0x2b8   :  { %v2637_v7 = vpop.f32.mrf.mxu0 }
 0x2b9   :  { %v2638_v10 = vadd.f32 %v2637_v7, %v2278_v6 }
 0x336   :  { %v2674_v9 = vpop.f32.mrf.mxu1 }
 0x337   :  { %v2675_v11 = vadd.f32 %v2674_v9, %v2636_v8 }
 0x338   :  { %v2676_v12 = vpop.f32.mrf.mxu1 }
 0x339   :  { %v2677_v13 = vadd.f32 %v2676_v12, %v2638_v10  ;;  %v2679_v15 = vmax.f32 %v2675_v11, 0.0 }
 0x33b   :  { %v2680_v14 = vmax.f32 %v2677_v13, 0.0 }
 0x33d   :  { %2848 = vmatprep.mubr.f32.mxu0 %v2680_v14 }
 0x33e   :  { %2849 = vmatmul.mubr.f32.vlgmr.msra.gmra.mxu0 %v2679_v15 }
 0x33f   :  { %3773 = vmatprep.mubr.msk.f32.mxu0 %vm4356_vm2, %v4355_v0  ;;  %3758 = vmatpush3.msra.mxu0 %v2956_v21 }
 0x340   :  { %3759 = vmatprep.subr.mxu0 %v4355_v0 }
 0x341   :  { %3760 = vmatpush3.msra.mxu0 %v2955_v22 }
 0x342   :  { %3761 = vmatprep.subr.mxu0 %v4355_v0 }
 0x343   :  { %3762 = vmatpush3.msra.mxu0 %v2954_v23 }
 0x344   :  { %3763 = vmatprep.subr.mxu0 %v4355_v0 }
 0x345   :  { %3764 = vmatpush3.msra.mxu0 %v2953_v24 }
 0x346   :  { %3765 = vmatprep.subr.mxu0 %v4355_v0 }
 0x347   :  { %3766 = vmatpush3.msra.mxu0 %v2952_v52 }
 0x348   :  { %3767 = vmatprep.subr.mxu0 %v4355_v0 }
 0x349   :  { %3768 = vmatpush3.msra.mxu0 %v2951_v37 }
 0x34a   :  { %3769 = vmatprep.subr.mxu0 %v4355_v0 }
 0x34b   :  { %3770 = vmatpush3.msra.mxu0 %v2950_v38 }
 0x34c   :  { %3771 = vmatprep.subr.mxu0 %v4355_v0 }
 0x34d   :  { %3772 = vmatpush3.msra.mxu0 %v2949_v39 }
 0x3fe   :  { %v3682_v32 = vpop.f32.mrf.mxu0 }
 0x400   :  { %v3683_v33 = vpop.f32.mrf.mxu0 }
 0x401   :  { %v3684_v34 = vadd.f32 %v3683_v33, %v3682_v32 }
 0x403   :  { %v2851_v35 = vadd.f32 %v3684_v34, %v3639_v47 }
 0x405   :  { %v2854_v36 = vmax.f32 %v2851_v35, 0.0 }
 0x407   :  { %3755 = vmatmul.mubr.f32.vlgmr.msra.gmra.mxu1 %v2854_v36 }
 0x408   :  { %3784 = vmatprep.mubr.msk.f32.mxu1 %vm4356_vm2, %v4355_v0  ;;  %3777 = vmatpush3.msra.mxu1 %v3042_v42 }
 0x409   :  { %3778 = vmatprep.subr.mxu1 %v4355_v0 }
 0x40a   :  { %3779 = vmatpush3.msra.mxu1 %v3041_v45 }
 0x40b   :  { %3780 = vmatprep.subr.mxu1 %v4355_v0 }
 0x40c   :  { %3781 = vmatpush3.msra.mxu1 %v3040_v48 }
 0x40d   :  { %3782 = vmatprep.subr.mxu1 %v4355_v0 }
 0x40e   :  { %3783 = vmatpush3.msra.mxu1 %v3039_v51 }
 0x40f   :  { %3787 = vmatprep.subr.mxu1 %v4355_v0 }
 0x4c7   :  { %v2944_v50 = vpop.f32.mrf.mxu1 }
 0x4c8   :  { %v2945_v44 = vadd.f32 %v3656_v43, %v2944_v50 }
 0x4c9   :  { %v3756_v46 = vpop.f32.mrf.mxu1 }
 0x4ca   :  { %v2948_v54 = vmax.f32 %v2945_v44, 0.0 }
 0x4cc   :  { %3774 = vmatmul.mubr.msk.f32.vlgmr.msra.gmra.mxu0 %vm2964_vm3, %v2948_v54 }
 0x58c   :  { %v3034_v56 = vpop.f32.mrf.mxu0 }
 0x58d   :  { %v3035_v58 = vadd.f32 %v3657_v55, %v3034_v56 }
 0x58e   :  { %v3775_v60 = vpop.f32.mrf.mxu0 }
 0x58f   :  { %v3038_v62 = vmax.f32 %v3035_v58, 0.0 }
 0x591   :  { %3785 = vmatmul.mubr.msk.f32.vlgmr.msra.gmra.mxu1 %vm3050_vm4, %v3038_v62 }
 0x592   :  { %3791 = vmatprep.mubr.msk.f32.mxu1 %vm4356_vm2, %v4355_v0  ;;  %3788 = vmatpush3.msra.mxu1 %v3126_v28 }
 0x593   :  { %3789 = vmatprep.subr.mxu1 %v4355_v0 }
 0x594   :  { %3790 = vmatpush3.msra.mxu1 %v3125_v40 }
 0x595   :  { %3794 = vmatprep.subr.mxu1 %v4355_v0 }
 0x651   :  { %v3120_v31 = vpop.f32.mrf.mxu1 }
 0x652   :  { %v3121_v57 = vadd.f32 %v3659_v26, %v3120_v31 }
 0x653   :  { %v3786_v41 = vpop.f32.mrf.mxu1 }
 0x654   :  { %v3124_v49 = vmax.f32 %v3121_v57, 0.0 }
 0x656   :  { %3792 = vmatmul.mubr.msk.f32.vlgmr.msra.gmra.mxu1 %vm3134_vm5, %v3124_v49 }
 0x657   :  { %3798 = vmatprep.mubr.msk.f32.mxu1 %vm4356_vm2, %v4355_v0  ;;  %3795 = vmatpush3.msk.msra.mxu1 %vm3221_vm6, %v3210_v53 }
 0x658   :  { %3796 = vmatprep.subr.mxu1 %v4355_v0 }
 0x659   :  { %3797 = vmatpush3.msra.mxu1 %v3209_v59 }
 0x716   :  { %v3204_v1 = vpop.f32.mrf.mxu1 }
 0x717   :  { %v3205_v61 = vadd.f32 %v3661_v63, %v3204_v1 }
 0x718   :  { %v3793_v3 = vpop.f32.mrf.mxu1 }
 0x719   :  { %v3208_v2 = vmax.f32 %v3205_v61, 0.0 }
 0x71b   :  { %3799 = vmatmul.mubr.msk.f32.vlgmr.msra.gmra.mxu1 %vm138_vm1, %v3208_v2 }
 0x7db   :  { %v3291_v20 = vpop.f32.mrf.mxu1 }
 0x7dc   :  { %v3292_v25 = vadd.f32 %v3663_v4, %v3291_v20 }
 0x7dd   :  { %v3800_v18 = vpop.f32.mrf.mxu1 }
 0x7de   :  { %3296 = vst.msk [vmem:[%s4776_s7] sm:$0xff] %vm3295_vm7, %v3292_v25 }
 0x7df   :  { %3301 = vsyncpa [#allocation3], 1 }
 0x7e0   :  { %3302 = vsyncpa [#allocation5], 1 }

</bundles_post_ra>
